<compile_context>
chip_gen: v7x
topology: tpu7x:2x2x1
jax: 0.10.0
libtpu: 0.0.40
codegen_flags: <defaults>
</compile_context>

<pallas_src>
import functools
import math

import numpy as np
import jax
import jax.numpy as jnp
from jax.experimental import pallas as pl
from jax.experimental.pallas import tpu as pltpu


def _round_up(x, m):
    return ((x + m - 1) // m) * m


def _cdiv(a, b):
    return -(-a // b)


def _bilinear_kernel(xl_ref, xr_ref, w_ref, b_ref, out_ref, z_ref, *,
                     left_features, right_features, lr_pad, l_pad):
    L, R = left_features, right_features
    LR = L * R
    lr_dn = (LR // 128) * 128        # 128-aligned start of the zero-padded region after z_bil

    @pl.when(pl.program_id(1) == 0)
    def _build_z():                  # once per batch tile; reused across all O tiles
        zdt = z_ref.dtype
        rows = z_ref.shape[0]
        # Zero the padding columns first with lane-aligned full-block stores; the data
        # segments below overwrite their parts.  (Runs per batch tile, so it is correct even
        # when the parallel batch axis is split across TensorCores.)
        z_ref[:, lr_dn:] = jnp.zeros((rows, z_ref.shape[1] - lr_dn), zdt)

        xl = xl_ref[...].astype(jnp.float32)     # outer product stays f32 on the VPU
        xr = xr_ref[...].astype(jnp.float32)
        # z_bil[n, l*R + r] = xl[n, l] * xr[n, r]
        z_bil = (xl[:, :, None] * xr[:, None, :]).reshape(rows, LR)
        z_ref[:, :LR] = z_bil.astype(zdt)
        z_ref[:, lr_pad:lr_pad + L] = xl.astype(zdt)
        z_ref[:, lr_pad + l_pad:lr_pad + l_pad + R] = xr.astype(zdt)

    # Bilinear term + both linear terms ride one MXU contraction (f32 accumulation).
    acc = jnp.dot(z_ref[...], w_ref[...], preferred_element_type=jnp.float32)
    out_ref[...] = (acc + b_ref[...]).astype(out_ref.dtype)


def pack_bilinear_params(U, W_l, W_r, bias=None, *, use_bf16=True):
    """Pack parameters ONCE (hoisted out of the per-call path).

    Column layout of z / row layout of Wbig (all segment starts 128-aligned):
      [0, L*R)                        : Uflat[l*R + r, o] = U[o, l, r]
      [lr_pad, lr_pad + L)            : W_l^T
      [lr_pad + l_pad, ... + R)       : W_r^T   (W_r declared (O, L); module requires L == R)
      everything else                 : zeros
    """
    out_f, L, R = U.shape
    assert W_l.shape == (out_f, L)
    assert W_r.shape[0] == out_f and L == R, "original module only works when L == R"

    LR = L * R
    lr_pad = _round_up(LR, 128)
    l_pad = _round_up(L, 128)
    r_pad = _round_up(R, 128)
    k_pad = lr_pad + l_pad + r_pad           # multiple of 128 -> no ragged MXU panel
    o_pad = _round_up(out_f, 128)            # lane-dense output stores

    u_flat = jnp.transpose(U, (1, 2, 0)).reshape(LR, out_f)   # u_flat[l*R+r, o] = U[o,l,r]
    w_big = jnp.zeros((k_pad, out_f), jnp.float32)
    w_big = w_big.at[:LR].set(u_flat.astype(jnp.float32))
    w_big = w_big.at[lr_pad:lr_pad + L].set(W_l.T.astype(jnp.float32))
    w_big = w_big.at[lr_pad + l_pad:lr_pad + l_pad + R].set(W_r.T.astype(jnp.float32))

    if bias is None:
        bias = jnp.zeros((out_f,), jnp.float32)
    b2 = bias.reshape(1, out_f).astype(jnp.float32)

    if o_pad != out_f:
        w_big = jnp.pad(w_big, ((0, 0), (0, o_pad - out_f)))
        b2 = jnp.pad(b2, ((0, 0), (0, o_pad - out_f)))

    w_big = w_big.astype(jnp.bfloat16 if use_bf16 else jnp.float32)

    return dict(w=w_big, b=b2, left=L, right=R, lr_pad=lr_pad, l_pad=l_pad,
                k_pad=k_pad, out=out_f, out_pad=o_pad, use_bf16=use_bf16)


def bilinear_apply(packed, input_left, input_right, *, tn=512,
                   _force_weight_budget_bytes=None):
    """Forward pass. Returns (N, out_features), N = prod of leading batch dims."""
    L, R = packed["left"], packed["right"]
    lr_pad, l_pad = packed["lr_pad"], packed["l_pad"]
    k_pad = packed["k_pad"]
    out_f, o_pad = packed["out"], packed["out_pad"]
    w_big, b2 = packed["w"], packed["b"]

    wsz = jnp.dtype(w_big.dtype).itemsize
    zdt = jnp.bfloat16 if packed["use_bf16"] else jnp.float32
    zsz = jnp.dtype(zdt).itemsize
    out_dtype = input_left.dtype
    out_isz = jnp.dtype(out_dtype).itemsize

    # Keep x in f32 so the in-kernel outer product runs at full precision on the VPU.
    xl = input_left.reshape(-1, L).astype(jnp.float32)
    xr = input_right.reshape(-1, R).astype(jnp.float32)
    N = xl.shape[0]

    # ---- device VMEM capacity (generation aware: v5e/v6e 128 MiB, v7x 64 MiB per TC) ----
    try:
        vmem_cap = int(pltpu.get_tpu_info().vmem_capacity_bytes)
    except Exception:
        vmem_cap = 64 * 1024 * 1024           # conservative fallback (v7x per-core VMEM)

    # ---- out_features tiling: keep the packed weight fully resident when it fits, else
    #      stream it over an inner "arbitrary" O grid axis (double-buffered). ----
    budget = (_force_weight_budget_bytes if _force_weight_budget_bytes is not None
              else int(0.35 * vmem_cap))
    if k_pad * o_pad * wsz <= budget:
        to, o_tiles, w_bufs = o_pad, 1, 1     # single resident weight block (Buffered(1))
    else:
        to = 128
        m = o_pad // 128
        for d in range(1, min(m, 8) + 1):     # TO up to 1024, must divide o_pad
            if m % d == 0 and 2 * k_pad * (128 * d) * wsz <= budget:
                to = 128 * d
        o_tiles, w_bufs = o_pad // to, 2

    # ---- batch tiling ----
    n16 = _round_up(max(N, 1), 16)            # 16-row granule (bf16 sublane packing)
    tn_eff = min(tn, n16)
    if n16 >= 32:
        # at least two batch tiles so the "parallel" axis can spread over v7x's 2 TensorCores
        tn_eff = min(tn_eff, _round_up(_cdiv(n16, 2), 16))
    tn_eff = max(16, _round_up(tn_eff, 16))

    def _vmem_est(tnv):
        return (2 * tnv * (L + R) * 4         # double-buffered x_l / x_r tiles (f32)
                + w_bufs * k_pad * to * wsz   # weight tile(s)
                + 2 * to * 4                  # bias
                + 2 * tnv * to * out_isz      # double-buffered output tile
                + tnv * k_pad * zsz           # persistent z scratch
                + tnv * L * R * 4             # f32 outer-product intermediate
                + tnv * to * 4)               # f32 matmul accumulator value

    while tn_eff > 16 and _vmem_est(tn_eff) > 0.6 * vmem_cap:
        tn_eff = max(16, _round_up(tn_eff // 2, 16))

    n_pad = _round_up(N, tn_eff)
    n_tiles = n_pad // tn_eff
    if n_pad != N:
        xl = jnp.pad(xl, ((0, n_pad - N), (0, 0)))
        xr = jnp.pad(xr, ((0, n_pad - N), (0, 0)))

    vmem_limit = int(min(max(32 * 1024 * 1024, 2 * _vmem_est(tn_eff)), 0.85 * vmem_cap))

    # Resident (constant index_map) weight/bias need only a single VMEM buffer.
    if o_tiles == 1:
        w_spec = pl.BlockSpec((k_pad, to), lambda i, j: (0, 0), pipeline_mode=pl.Buffered(1))
        b_spec = pl.BlockSpec((1, to), lambda i, j: (0, 0), pipeline_mode=pl.Buffered(1))
    else:
        w_spec = pl.BlockSpec((k_pad, to), lambda i, j: (0, j))
        b_spec = pl.BlockSpec((1, to), lambda i, j: (0, j))

    kernel = functools.partial(_bilinear_kernel, left_features=L, right_features=R,
                               lr_pad=lr_pad, l_pad=l_pad)

    # TODO(synk): when out_features << 128 and N is huge, fold a factor of 128/out_features of
    # the batch into the lane dim to avoid the o_pad-wide padded HBM writeback.
    # TODO(synk): for repeated per-layer calls on v5e, hide the one-time weight DMA with a
    # cross-pallas_call VMEM/semaphore future instead of paying it at grid step 0.
    out_padded = pl.pallas_call(
        kernel,
        out_shape=jax.ShapeDtypeStruct((n_pad, o_pad), out_dtype),
        grid_spec=pltpu.PrefetchScalarGridSpec(
            num_scalar_prefetch=0,
            grid=(n_tiles, o_tiles),          # batch outer (parallel), O inner (arbitrary)
            in_specs=[
                pl.BlockSpec((tn_eff, L), lambda i, j: (i, 0)),   # x_l batch tile
                pl.BlockSpec((tn_eff, R), lambda i, j: (i, 0)),   # x_r batch tile
                w_spec,                                           # packed fused weights
                b_spec,                                           # bias
            ],
            out_specs=pl.BlockSpec((tn_eff, to), lambda i, j: (i, j)),
            scratch_shapes=[pltpu.VMEM((tn_eff, k_pad), zdt)],    # z, reused across O tiles
        ),
        compiler_params=pltpu.CompilerParams(
            dimension_semantics=("parallel", "arbitrary"),
            vmem_limit_bytes=vmem_limit),
    )(xl, xr, w_big, b2)

    return out_padded[:N, :out_f]


def bilinear_pallas(input_left, input_right, U, W_l, W_r, bias, *, tn=512, use_bf16=True):
    # Convenience one-shot wrapper; in real use call pack_bilinear_params once and reuse it.
    packed = pack_bilinear_params(U, W_l, W_r, bias, use_bf16=use_bf16)
    return bilinear_apply(packed, input_left, input_right, tn=tn)


def _xavier_uniform(key, shape):
    # Matches torch.nn.init.xavier_uniform_ fan computation.
    if len(shape) == 2:
        fan_in, fan_out = shape[1], shape[0]
    else:
        rf = int(np.prod(shape[2:]))
        fan_in, fan_out = shape[1] * rf, shape[0] * rf
    a = math.sqrt(6.0 / (fan_in + fan_out))
    return jax.random.uniform(key, shape, jnp.float32, -a, a)


def _reference_np(input_left, input_right, U, W_l, W_r, bias):
    xl = np.asarray(input_left, np.float64).reshape(-1, U.shape[1])
    xr = np.asarray(input_right, np.float64).reshape(-1, U.shape[2])
    Un = np.asarray(U, np.float64)
    Wln = np.asarray(W_l, np.float64)
    Wrn = np.asarray(W_r, np.float64)
    bn = np.asarray(bias, np.float64)
    out = np.einsum('nl,olr,nr->no', xl, Un, xr) + bn[None, :]
    return out + xl @ Wln.T + xr @ Wrn.T


if __name__ == "__main__":
    key = jax.random.PRNGKey(0)

    def make_params(k, L, R, O):
        k_u, k_wl, k_wr, k_b = jax.random.split(k, 4)
        U = _xavier_uniform(k_u, (O, L, R))
        W_l = _xavier_uniform(k_wl, (O, L))
        W_r = _xavier_uniform(k_wr, (O, L))
        bias = 0.1 * jax.random.normal(k_b, (O,), jnp.float32)
        return U, W_l, W_r, bias

    # ---- Config A: module-like small shapes: batch (2, 8), features 32 ----
    L = R = O = 32
    k_p, k_xl, k_xr, key = jax.random.split(key, 4)
    U, W_l, W_r, bias = make_params(k_p, L, R, O)
    x_left = jax.random.normal(k_xl, (2, 8, L), jnp.float32)
    x_right = jax.random.normal(k_xr, (2, 8, R), jnp.float32)
    ref = _reference_np(x_left, x_right, U, W_l, W_r, bias)

    # f32 path: tight tolerance against the fp64 reference.
    packed_f32 = pack_bilinear_params(U, W_l, W_r, bias, use_bf16=False)
    out = jax.block_until_ready(bilinear_apply(packed_f32, x_left, x_right))
    np.testing.assert_allclose(np.asarray(out, np.float64), ref, rtol=5e-4, atol=5e-4)

    # Default bf16 path (bf16 weights/z, f32 outer product + f32 MXU accumulation).
    packed_bf16 = pack_bilinear_params(U, W_l, W_r, bias)     # use_bf16=True default
    out = jax.block_until_ready(bilinear_apply(packed_bf16, x_left, x_right))
    np.testing.assert_allclose(np.asarray(out, np.float64), ref, rtol=5e-2, atol=5e-2)

    # ---- Config B: multiple batch tiles + forced O tiling (exercises streamed-weight path) ----
    L = R = 32
    O = 256
    N = 300
    k_p, k_xl, k_xr, key = jax.random.split(key, 4)
    U, W_l, W_r, bias = make_params(k_p, L, R, O)
    x_left = jax.random.normal(k_xl, (N, L), jnp.float32)
    x_right = jax.random.normal(k_xr, (N, R), jnp.float32)
    ref = _reference_np(x_left, x_right, U, W_l, W_r, bias)
    packed = pack_bilinear_params(U, W_l, W_r, bias)
    out = jax.block_until_ready(
        bilinear_apply(packed, x_left, x_right, tn=128,
                       _force_weight_budget_bytes=400_000))
    np.testing.assert_allclose(np.asarray(out, np.float64), ref, rtol=5e-2, atol=5e-2)

    print("KERNEL_OK")
</pallas_src>

<mosaic_0001>
module attributes {stable_mosaic.version = 11 : i64} {
  func.func @_bilinear_kernel(%arg0: i32, %arg1: i32, %arg2: memref<16x32xf32, #tpu.memory_space<vmem>>, %arg3: memref<16x32xf32, #tpu.memory_space<vmem>>, %arg4: memref<1280x128xf32, #tpu.memory_space<vmem>>, %arg5: memref<1x128xf32, #tpu.memory_space<vmem>>, %arg6: memref<16x128xf32, #tpu.memory_space<vmem>>, %arg7: memref<16x1280xf32, #tpu.memory_space<vmem>>) attributes {dimension_semantics = [#tpu.dimension_semantics<parallel>, #tpu.dimension_semantics<arbitrary>], iteration_bounds = array<i64: 1, 1>, scalar_prefetch = 0 : i64, scratch_operands = 1 : i64, tpu.core_type = #tpu.core_type<tc>, window_params = [{transform_indices = @transform_0, window_bounds = array<i64: 16, 32>}, {transform_indices = @transform_1, window_bounds = array<i64: 16, 32>}, {pipeline_mode = #tpu.pipeline_mode<synchronous>, transform_indices = @transform_2, window_bounds = array<i64: 1280, 128>}, {pipeline_mode = #tpu.pipeline_mode<synchronous>, transform_indices = @transform_3, window_bounds = array<i64: 1, 128>}, {transform_indices = @transform_4, window_bounds = array<i64: 16, 128>}]} {
    %c0_i32 = arith.constant 0 : i32
    %0 = arith.cmpi eq, %arg1, %c0_i32 : i32
    %1 = arith.extui %0 : i1 to i32
    %c0_i32_0 = arith.constant 0 : i32
    %2 = arith.cmpi ne, %1, %c0_i32_0 : i32
    scf.if %2 {
      %cst_8 = arith.constant 0.000000e+00 : f32
      %10 = vector.broadcast %cst_8 : f32 to vector<16x256xf32>
      %c0_9 = arith.constant 0 : index
      %c1024 = arith.constant 1024 : index
      %11 = vector.load %arg7[%c0_9, %c1024] : memref<16x1280xf32, #tpu.memory_space<vmem>>, vector<16x256xf32>
      tpu.vector_store %arg7[%c0_9, %c1024], %10 {strides = array<i32>} : memref<16x1280xf32, #tpu.memory_space<vmem>>, vector<16x256xf32>,
      %c0_10 = arith.constant 0 : index
      %c0_11 = arith.constant 0 : index
      %12 = vector.load %arg2[%c0_10, %c0_11] : memref<16x32xf32, #tpu.memory_space<vmem>>, vector<16x32xf32>
      %c0_12 = arith.constant 0 : index
      %c0_13 = arith.constant 0 : index
      %13 = vector.load %arg3[%c0_12, %c0_13] : memref<16x32xf32, #tpu.memory_space<vmem>>, vector<16x32xf32>
      %14 = vector.shape_cast %12 : vector<16x32xf32> to vector<16x32x1xf32>
      %15 = vector.shape_cast %13 : vector<16x32xf32> to vector<16x1x32xf32>
      %16 = vector.broadcast %14 : vector<16x32x1xf32> to vector<16x32x32xf32>
      %17 = vector.broadcast %15 : vector<16x1x32xf32> to vector<16x32x32xf32>
      %18 = arith.mulf %16, %17 : vector<16x32x32xf32>
      %19 = vector.shape_cast %18 : vector<16x32x32xf32> to vector<16x1024xf32>
      %c0_14 = arith.constant 0 : index
      %c0_15 = arith.constant 0 : index
      %20 = vector.load %arg7[%c0_14, %c0_15] : memref<16x1280xf32, #tpu.memory_space<vmem>>, vector<16x1024xf32>
      tpu.vector_store %arg7[%c0_14, %c0_15], %19 {strides = array<i32>} : memref<16x1280xf32, #tpu.memory_space<vmem>>, vector<16x1024xf32>,
      %c0_16 = arith.constant 0 : index
      %c1024_17 = arith.constant 1024 : index
      %21 = vector.load %arg7[%c0_16, %c1024_17] : memref<16x1280xf32, #tpu.memory_space<vmem>>, vector<16x32xf32>
      tpu.vector_store %arg7[%c0_16, %c1024_17], %12 {strides = array<i32>} : memref<16x1280xf32, #tpu.memory_space<vmem>>, vector<16x32xf32>,
      %c0_18 = arith.constant 0 : index
      %c1152 = arith.constant 1152 : index
      %22 = vector.load %arg7[%c0_18, %c1152] : memref<16x1280xf32, #tpu.memory_space<vmem>>, vector<16x32xf32>
      tpu.vector_store %arg7[%c0_18, %c1152], %13 {strides = array<i32>} : memref<16x1280xf32, #tpu.memory_space<vmem>>, vector<16x32xf32>,
    } else {
    }
    %c0 = arith.constant 0 : index
    %c0_1 = arith.constant 0 : index
    %3 = vector.load %arg7[%c0, %c0_1] : memref<16x1280xf32, #tpu.memory_space<vmem>>, vector<16x1280xf32>
    %c0_2 = arith.constant 0 : index
    %c0_3 = arith.constant 0 : index
    %4 = vector.load %arg4[%c0_2, %c0_3] : memref<1280x128xf32, #tpu.memory_space<vmem>>, vector<1280x128xf32>
    %cst = arith.constant dense<0.000000e+00> : vector<16x128xf32>
    %5 = tpu.matmul %3, %4, %cst {dimension_numbers = #tpu.dot_dimension_numbers<[1], [0], [0], [1], [0, 0, 1, 1], [], []>} : vector<16x1280xf32>, vector<1280x128xf32>, vector<16x128xf32> -> vector<16x128xf32>
    %c0_4 = arith.constant 0 : index
    %c0_5 = arith.constant 0 : index
    %6 = vector.load %arg5[%c0_4, %c0_5] : memref<1x128xf32, #tpu.memory_space<vmem>>, vector<1x128xf32>
    %7 = vector.broadcast %6 : vector<1x128xf32> to vector<16x128xf32>
    %8 = arith.addf %5, %7 : vector<16x128xf32>
    %c0_6 = arith.constant 0 : index
    %c0_7 = arith.constant 0 : index
    %9 = vector.load %arg6[%c0_6, %c0_7] : memref<16x128xf32, #tpu.memory_space<vmem>>, vector<16x128xf32>
    tpu.vector_store %arg6[%c0_6, %c0_7], %8 {strides = array<i32>} : memref<16x128xf32, #tpu.memory_space<vmem>>, vector<16x128xf32>,
    return
  }
  func.func @transform_0(%arg0: i32, %arg1: i32) -> (i32, i32) {
    %c0_i32 = arith.constant 0 : i32
    %c0_i32_0 = arith.constant 0 : i32
    return %arg0, %c0_i32 : i32, i32
  }
  func.func @transform_1(%arg0: i32, %arg1: i32) -> (i32, i32) {
    %c0_i32 = arith.constant 0 : i32
    %c0_i32_0 = arith.constant 0 : i32
    return %arg0, %c0_i32 : i32, i32
  }
  func.func @transform_2(%arg0: i32, %arg1: i32) -> (i32, i32) {
    %c0_i32 = arith.constant 0 : i32
    %c0_i32_0 = arith.constant 0 : i32
    %c0_i32_1 = arith.constant 0 : i32
    return %c0_i32, %c0_i32_0 : i32, i32
  }
  func.func @transform_3(%arg0: i32, %arg1: i32) -> (i32, i32) {
    %c0_i32 = arith.constant 0 : i32
    %c0_i32_0 = arith.constant 0 : i32
    %c0_i32_1 = arith.constant 0 : i32
    return %c0_i32, %c0_i32_0 : i32, i32
  }
  func.func @transform_4(%arg0: i32, %arg1: i32) -> (i32, i32) {
    %c0_i32 = arith.constant 0 : i32
    return %arg0, %arg1 : i32, i32
  }
}

</mosaic_0001>

<bundles_post_ra>
// kernel: tpu_custom_call.1
= control target key start
LH: loop header
LB: loop body
LE: loop exit
PB: predicated region body
PF: predicated region fallthrough
CT: control target
= control target key end

     0   :  { %9 = vsyncpa [#allocation4], 0  ;;  %s4015_s0 = inlined_call_operand.hbm [shape: f32[16,32], index: 0, kind: input, shape index: {}]   ;;  %s4016_s1 = inlined_call_operand.hbm [shape: f32[16,32], index: 1, kind: input, shape index: {}]   ;;  %s4017_s2 = inlined_call_operand.hbm [shape: f32[1280,128], index: 2, kind: input, shape index: {}]   ;;  %s4018_s3 = inlined_call_operand.vmem [shape: f32[1,128], index: 3, kind: input, shape index: {}]   ;;  %s4019_s4 = inlined_call_operand.hbm [shape: f32[16,128], index: 4, kind: output, shape index: {}]  }
   0x1   :  { %10 = vsyncpa [#allocation7], 0 }
   0x2   :  { %11 = vsyncpa [#allocation5], 0  ;;  %s3026_s15 = smov [#allocation6]   ;;  %s3027_s17 = smov [#allocation3]  }
   0x3   :  { %s29_s16 = sshll.u32 %s3026_s15, 4  ;;  %s17_s18 = sshll.u32 %s3027_s17, 4  ;;  %s30_s16 = int_to_ptr.vmem [resolvable:$true] %s29_s16  ;;  %s3064_s18 = int_to_ptr.vmem [resolvable:$true] %s17_s18 }
   0x4   :  { %s2932_s21 = scalar_lea.hbm %s4016_s1, 256 }
   0x5   :  { %p2933_p0 = scmp.ne.s32.totalorder %s4016_s1, %s2932_s21  ;;  %p2936_p1 = scmp.lt.u32.totalorder %s2932_s21, %s4016_s1 }
   0x7   :  { %p2938_p2 = pnand %p2936_p1, %p2933_p0 }
   0x9   :  { %2941 = shalt.err (!%p2938_p2)
}
   0xa   :  { %s2942_s26 = scalar_lea.vmem %s30_s16, 256  ;;  %p2947_p4 = scmp.lt.s32.totalorder %s30_s16, %s30_s16 }
   0xb   :  { %p2943_p3 = scmp.ne.s32.totalorder %s30_s16, %s2942_s26  ;;  %p2948_p5 = scmp.lt.s32.totalorder %s2942_s26, %s2942_s26 }
   0xd   :  { %p2949_p6 = por %p2948_p5, %p2947_p4 }
   0xf   :  { %p2950_p7 = pnand %p2949_p6, %p2943_p3 }
  0x11   :  { %2953 = shalt.err (!%p2950_p7)
}
  0x12   :  { %s3028_s27 = smov 128   ;;  %s3029_s28 = smov 8  }
  0x13   :  { %35 = dma.hbm_to_vmem [thread:$0]  %s4016_s1, 256, %s30_s16, [#allocation7], %s3028_s27, %s3028_s27, %s3029_s28  }
  0x14   :  { %s2954_s7 = scalar_lea.hbm %s4015_s0, 256 }
  0x15   :  { %p2955_p8 = scmp.ne.s32.totalorder %s4015_s0, %s2954_s7  ;;  %p2958_p9 = scmp.lt.u32.totalorder %s2954_s7, %s4015_s0 }
  0x17   :  { %p2960_p10 = pnand %p2958_p9, %p2955_p8 }
  0x19   :  { %2963 = shalt.err (!%p2960_p10)
}
  0x1a   :  { %s2964_s12 = scalar_lea.vmem %s3064_s18, 256  ;;  %p2969_p12 = scmp.lt.s32.totalorder %s3064_s18, %s3064_s18 }
  0x1b   :  { %p2965_p11 = scmp.ne.s32.totalorder %s3064_s18, %s2964_s12  ;;  %p2970_p13 = scmp.lt.s32.totalorder %s2964_s12, %s2964_s12 }
  0x1d   :  { %p2971_p0 = por %p2970_p13, %p2969_p12 }
  0x1f   :  { %p2972_p1 = pnand %p2971_p0, %p2965_p11 }
  0x21   :  { %2975 = shalt.err (!%p2972_p1)
}
  0x22   :  { %23 = dma.hbm_to_vmem [thread:$0]  %s4015_s0, 256, %s3064_s18, [#allocation4], %s3028_s27, %s3028_s27, %s3029_s28  }
  0x23   :  { %s3030_s14 = smov [#allocation8]   ;;  %s2976_s19 = scalar_lea.hbm %s4017_s2, 20480 }
  0x24   :  { %s41_s15 = sshll.u32 %s3030_s14, 4  ;;  %p2977_p2 = scmp.ne.s32.totalorder %s4017_s2, %s2976_s19  ;;  %s42_s15 = int_to_ptr.vmem [resolvable:$true] %s41_s15 }
  0x25   :  { %p2980_p3 = scmp.lt.u32.totalorder %s2976_s19, %s4017_s2 }
  0x27   :  { %p2982_p4 = pnand %p2980_p3, %p2977_p2 }
  0x29   :  { %2985 = shalt.err (!%p2982_p4)
}
  0x2a   :  { %s2986_s24 = scalar_lea.vmem %s42_s15, 20480  ;;  %p2991_p6 = scmp.lt.s32.totalorder %s42_s15, %s42_s15 }
  0x2b   :  { %p2987_p5 = scmp.ne.s32.totalorder %s42_s15, %s2986_s24  ;;  %p2992_p7 = scmp.lt.s32.totalorder %s2986_s24, %s2986_s24 }
  0x2d   :  { %p2993_p8 = por %p2992_p7, %p2991_p6 }
  0x2f   :  { %p2994_p9 = pnand %p2993_p8, %p2987_p5 }
  0x31   :  { %2997 = shalt.err (!%p2994_p9)
}
  0x32   :  { %47 = dma.hbm_to_vmem [thread:$0]  %s4017_s2, 20480, %s42_s15, [#allocation7], %s3028_s27, %s3028_s27, %s3029_s28  }
  0x33   :  { %3020 = dma.done.wait [#allocation4], 256  }
  0x34   :  { %3021 = vsyncadd [#allocation4], 4294967040 }
  0x35   :  { %3022 = dma.done.wait [#allocation7], 20736  }
  0x36   :  { %3023 = vsyncadd [#allocation7], 4294946560  ;;  %v71_v0 = vlaneseq  ;;  %v3031_v2 = vmov 0.0   ;;  %v3032_v5 = vmov 1966171168   ;;  %v3122_v7 = vld [vmem:[#allocation3] sm:$0xff] }
  0x37   :  { %63 = vst [vmem:[#allocation2 + $0x40] sm:$0xff] %v3031_v2  ;;  %64 = vst [vmem:[#allocation2 + $0x48] sm:$0xff] %v3031_v2  ;;  %v379_v6 = vunpack.c.l.s4 %v3032_v5  ;;  %v3124_v8 = vld [vmem:[#allocation3 + $0x8] sm:$0xff]  ;;  %v69_v9 = vld [vmem:[#allocation6] sm:$0xff]  ;;  %vm1899_vm0 = vcmask 261120   ;;  %s3035_s2 = smov 32  }
  0x38   :  { %v3116_v1 = vshrl.u32 %v71_v0, 7  ;;  %65 = vst [vmem:[#allocation2 + $0x90] sm:$0xff] %v3031_v2  ;;  %66 = vst [vmem:[#allocation2 + $0x98] sm:$0xff] %v3031_v2  ;;  %v377_v15 = vcombine.high %v69_v9, %v69_v9  ;;  %v70_v41 = vld [vmem:[#allocation6 + $0x8] sm:$0xff]  ;;  %s3036_s25 = smov 64   ;;  %s3037_s26 = smov 96  }
  0x39   :  { %v380_v12 = vunpack.c.0.s8 %v379_v6  ;;  %1968 = vst.msk [vmem:[#allocation2 + $0x48] sm:$0xff] %vm1899_vm0, %v69_v9  ;;  %1966 = vst.msk [vmem:[#allocation2 + $0x40] sm:$0xff] %vm1899_vm0, %v3122_v7  ;;  %v426_v58 = vcombine.high %v70_v41, %v70_v41  ;;  %vm1902_vm1 = vcmask 523264   ;;  %vm1905_vm2 = vcmask 785408  }
  0x3a   :  { %v3119_v3 = vsub.s32 0, %v3116_v1  ;;  %v92_v4 = vsub.s32 1, %v3116_v1  ;;  %1967 = vst.msk [vmem:[#allocation2 + $0x90] sm:$0xff] %vm1899_vm0, %v3124_v8  ;;  %v111_v13 = vsub.s32 2, %v3116_v1  ;;  %v130_v16 = vsub.s32 3, %v3116_v1  ;;  %1969 = vst.msk [vmem:[#allocation2 + $0x98] sm:$0xff] %vm1899_vm0, %v70_v41 }
  0x3b   :  { %v3144_v14 = vsub.s32 %v380_v12, %v3116_v1  ;;  %v149_v25 = vsub.s32 4, %v3116_v1  ;;  %v168_v38 = vsub.s32 5, %v3116_v1  ;;  %v187_v45 = vsub.s32 6, %v3116_v1 }
  0x3c   :  { %v3129_v10 = vrot.slane %v3122_v7, %v92_v4  ;;  %v3133_v11 = vrot.slane %v3122_v7, %v3119_v3  ;;  %v3152_v17 = vrot.slane %v3122_v7, %v111_v13  ;;  %v3161_v24 = vrot.slane %v3122_v7, %v130_v16 }
  0x3d   :  { %v384_v18 = vrot.slane %v69_v9, %v3144_v14  ;;  %v391_v19 = vrot.slane %v377_v15, %v3144_v14  ;;  %v3191_v37 = vrot.slane %v3122_v7, %v149_v25  ;;  %v433_v43 = vrot.slane %v70_v41, %v3144_v14 }
  0x3e   :  { %95 = vbcast.lane.b32.xlu1 %v3129_v10, 256  ;;  %76 = vbcast.lane.b32.xlu0 %v3133_v11, 256  ;;  %v3205_v44 = vrot.slane %v3122_v7, %v168_v38  ;;  %v188_v49 = vrot.slane %v3122_v7, %v187_v45  ;;  %v206_v50 = vsub.s32 7, %v3116_v1  ;;  %v226_v56 = vrot.slane %v3124_v8, %v3119_v3 }
  0x3f   :  { %v392_v20 = vcombine.high %v384_v18, %v384_v18  ;;  %v400_v21 = vrot.slane %v384_v18, %v3144_v14  ;;  %v407_v22 = vrot.slane %v391_v19, %v3144_v14  ;;  %v393_v23 = vcombine.high %v391_v19, %v391_v19 }
  0x40   :  { %v449_v46 = vrot.slane %v433_v43, %v3144_v14  ;;  %v441_v48 = vcombine.high %v433_v43, %v433_v43  ;;  %v207_v53 = vrot.slane %v3122_v7, %v206_v50  ;;  %v245_v60 = vrot.slane %v3124_v8, %v92_v4 }
  0x41   :  { %v414_v26 = vrot.slane %v392_v20, %v3144_v14  ;;  %v3168_v27 = vrot.slane %v400_v21, %v3119_v3  ;;  %v422_v28 = vcombine.high %v400_v21, %v400_v21  ;;  %v3171_v29 = vrot.slane %v407_v22, %v3119_v3 }
  0x42   :  { %99 = vbcast.lane.b32.xlu1 %v3129_v10, 264  ;;  %80 = vbcast.lane.b32.xlu0 %v3133_v11, 264  ;;  %v421_v30 = vrot.slane %v393_v23, %v3144_v14  ;;  %v423_v31 = vcombine.high %v407_v22, %v407_v22  ;;  %v3210_v47 = vrot.slane %v449_v46, %v3119_v3 }
  0x43   :  { %v3175_v32 = vrot.slane %v414_v26, %v3119_v3  ;;  %v3178_v33 = vrot.slane %v422_v28, %v3119_v3  ;;  %v424_v34 = vcombine.high %v414_v26, %v414_v26  ;;  %v463_v51 = vrot.slane %v441_v48, %v3144_v14 }
  0x44   :  { %v3181_v35 = vrot.slane %v421_v30, %v3119_v3  ;;  %v3184_v36 = vrot.slane %v423_v31, %v3119_v3  ;;  %v425_v40 = vcombine.high %v421_v30, %v421_v30  ;;  %v471_v54 = vcombine.high %v449_v46, %v449_v46 }
  0x45   :  { %v3195_v39 = vrot.slane %v424_v34, %v3119_v3  ;;  %v3218_v52 = vrot.slane %v463_v51, %v3119_v3  ;;  %v473_v57 = vcombine.high %v463_v51, %v463_v51  ;;  %v440_v61 = vrot.slane %v426_v58, %v3144_v14 }
  0x46   :  { %118 = vbcast.lane.b32.xlu1 %v3152_v17, 264  ;;  %114 = vbcast.lane.b32.xlu0 %v3152_v17, 256  ;;  %v3198_v42 = vrot.slane %v425_v40, %v3119_v3  ;;  %v3222_v55 = vrot.slane %v471_v54, %v3119_v3  ;;  %v264_v63 = vrot.slane %v3124_v8, %v111_v13  ;;  %v3034_v46 = vmov 1934713408  }
  0x47   :  { %v3227_v59 = vrot.slane %v473_v57, %v3119_v3  ;;  %v456_v62 = vrot.slane %v440_v61, %v3144_v14  ;;  %v442_v2 = vcombine.high %v440_v61, %v440_v61  ;;  %v283_v4 = vrot.slane %v3124_v8, %v130_v16 }
  0x48   :  { %v302_v12 = vrot.slane %v3124_v8, %v149_v25  ;;  %v340_v16 = vrot.slane %v3124_v8, %v187_v45  ;;  %v359_v18 = vrot.slane %v3124_v8, %v206_v50  ;;  %v686_v48 = vunpack.c.l.s4 %v3034_v46  ;;  %v2009_v46 = vld [vmem:[#allocation8 + $0x98] sm:$0xff] }
  0x49   :  { %v3238_v0 = vrot.slane %v456_v62, %v3119_v3  ;;  %v470_v5 = vrot.slane %v442_v2, %v3144_v14  ;;  %v472_v7 = vcombine.high %v456_v62, %v456_v62  ;;  %v321_v14 = vrot.slane %v3124_v8, %v168_v38 }
  0x4a   :  { %137 = vbcast.lane.b32.xlu1 %v3161_v24, 264  ;;  %133 = vbcast.lane.b32.xlu0 %v3161_v24, 256  ;;  %v687_v2 = vunpack.c.0.s8 %v686_v48  ;;  %v2040_v48 = vld [vmem:[#allocation8 + $0x190] sm:$0xff] }
  0x4b   :  { %v3245_v6 = vrot.slane %v470_v5, %v3119_v3  ;;  %v3248_v9 = vrot.slane %v472_v7, %v3119_v3  ;;  %v474_v13 = vcombine.high %v470_v5, %v470_v5 }
  0x4d   :  { %v3255_v15 = vrot.slane %v474_v13, %v3119_v3 }
  0x4e   :  { %156 = vbcast.lane.b32.xlu1 %v3191_v37, 264  ;;  %152 = vbcast.lane.b32.xlu0 %v3191_v37, 256 }
  0x52   :  { %175 = vbcast.lane.b32.xlu1 %v3205_v44, 264  ;;  %171 = vbcast.lane.b32.xlu0 %v3205_v44, 256 }
  0x56   :  { %194 = vbcast.lane.b32.xlu1 %v188_v49, 264  ;;  %190 = vbcast.lane.b32.xlu0 %v188_v49, 256 }
  0x5a   :  { %213 = vbcast.lane.b32.xlu1 %v207_v53, 264  ;;  %209 = vbcast.lane.b32.xlu0 %v207_v53, 256 }
  0x5e   :  { %232 = vbcast.lane.b32.xlu1 %v226_v56, 264  ;;  %228 = vbcast.lane.b32.xlu0 %v226_v56, 256 }
  0x62   :  { %251 = vbcast.lane.b32.xlu1 %v245_v60, 264  ;;  %247 = vbcast.lane.b32.xlu0 %v245_v60, 256 }
  0x66   :  { %270 = vbcast.lane.b32.xlu1 %v264_v63, 264  ;;  %266 = vbcast.lane.b32.xlu0 %v264_v63, 256 }
  0x6a   :  { %289 = vbcast.lane.b32.xlu1 %v283_v4, 264  ;;  %285 = vbcast.lane.b32.xlu0 %v283_v4, 256 }
  0x6e   :  { %308 = vbcast.lane.b32.xlu1 %v302_v12, 264  ;;  %304 = vbcast.lane.b32.xlu0 %v302_v12, 256 }
  0x72   :  { %327 = vbcast.lane.b32.xlu1 %v321_v14, 264  ;;  %323 = vbcast.lane.b32.xlu0 %v321_v14, 256 }
  0x76   :  { %346 = vbcast.lane.b32.xlu1 %v340_v16, 264  ;;  %342 = vbcast.lane.b32.xlu0 %v340_v16, 256 }
  0x7a   :  { %365 = vbcast.lane.b32.xlu1 %v359_v18, 264  ;;  %361 = vbcast.lane.b32.xlu0 %v359_v18, 256 }
  0x7e   :  { %88 = vbcast.lane.b32.xlu1 %v3133_v11, 280  ;;  %84 = vbcast.lane.b32.xlu0 %v3133_v11, 272 }
  0x82   :  { %107 = vbcast.lane.b32.xlu1 %v3129_v10, 280  ;;  %103 = vbcast.lane.b32.xlu0 %v3129_v10, 272  ;;  %v3033_v10 = vmov 1983009808  }
  0x83   :  { %v622_v11 = vunpack.c.l.s4 %v3033_v10 }
  0x85   :  { %v623_v20 = vunpack.c.0.s8 %v622_v11 }
  0x86   :  { %126 = vbcast.lane.b32.xlu1 %v3152_v17, 280  ;;  %122 = vbcast.lane.b32.xlu0 %v3152_v17, 272 }
  0x87   :  { %v3276_v40 = vsub.s32 %v623_v20, %v3116_v1  ;;  %v2038_v20 = vld [vmem:[#allocation8 + $0x180] sm:$0xff] }
  0x8a   :  { %145 = vbcast.lane.b32.xlu1 %v3161_v24, 280  ;;  %141 = vbcast.lane.b32.xlu0 %v3161_v24, 272 }
  0x8e   :  { %164 = vbcast.lane.b32.xlu1 %v3191_v37, 280  ;;  %160 = vbcast.lane.b32.xlu0 %v3191_v37, 272 }
  0x92   :  { %183 = vbcast.lane.b32.xlu1 %v3205_v44, 280  ;;  %179 = vbcast.lane.b32.xlu0 %v3205_v44, 272 }
  0x96   :  { %202 = vbcast.lane.b32.xlu1 %v188_v49, 280  ;;  %198 = vbcast.lane.b32.xlu0 %v188_v49, 272 }
  0x9a   :  { %221 = vbcast.lane.b32.xlu1 %v207_v53, 280  ;;  %217 = vbcast.lane.b32.xlu0 %v207_v53, 272 }
  0x9e   :  { %240 = vbcast.lane.b32.xlu1 %v226_v56, 280  ;;  %236 = vbcast.lane.b32.xlu0 %v226_v56, 272 }
  0xa2   :  { %259 = vbcast.lane.b32.xlu1 %v245_v60, 280  ;;  %255 = vbcast.lane.b32.xlu0 %v245_v60, 272 }
  0xa6   :  { %278 = vbcast.lane.b32.xlu1 %v264_v63, 280  ;;  %274 = vbcast.lane.b32.xlu0 %v264_v63, 272 }
  0xaa   :  { %297 = vbcast.lane.b32.xlu1 %v283_v4, 280  ;;  %293 = vbcast.lane.b32.xlu0 %v283_v4, 272 }
  0xae   :  { %316 = vbcast.lane.b32.xlu1 %v302_v12, 280  ;;  %312 = vbcast.lane.b32.xlu0 %v302_v12, 272 }
  0xb0   :  { %v96_v3 = vpop.permute.xlu1 %95  ;;  %v77_v8 = vpop.permute.xlu0 %76 }
  0xb1   :  { %v555_v23 = vmul.f32 %v3168_v27, %v77_v8  ;;  %v559_v41 = vmul.f32 %v3175_v32, %v96_v3 }
  0xb2   :  { %335 = vbcast.lane.b32.xlu1 %v321_v14, 280  ;;  %331 = vbcast.lane.b32.xlu0 %v321_v14, 272 }
  0xb4   :  { %v100_v17 = vpop.permute.xlu1 %99  ;;  %v81_v19 = vpop.permute.xlu0 %80 }
  0xb5   :  { %v556_v24 = vmul.f32 %v3168_v27, %v81_v19  ;;  %v560_v43 = vmul.f32 %v3175_v32, %v100_v17  ;;  %v2006_v17 = vld [vmem:[#allocation8 + $0x80] sm:$0xff]  ;;  %v2007_v19 = vld [vmem:[#allocation8 + $0x88] sm:$0xff] }
  0xb6   :  { %354 = vbcast.lane.b32.xlu1 %v340_v16, 280  ;;  %350 = vbcast.lane.b32.xlu0 %v340_v16, 272 }
  0xb8   :  { %v119_v21 = vpop.permute.xlu1 %118  ;;  %v115_v22 = vpop.permute.xlu0 %114 }
  0xb9   :  { %v564_v25 = vmul.f32 %v3178_v33, %v119_v21  ;;  %v563_v26 = vmul.f32 %v3178_v33, %v115_v22  ;;  %v2039_v21 = vld [vmem:[#allocation8 + $0x188] sm:$0xff]  ;;  %v1990_v22 = vld [vmem:[#allocation8] sm:$0xff] }
  0xba   :  { %373 = vbcast.lane.b32.xlu1 %v359_v18, 280  ;;  %369 = vbcast.lane.b32.xlu0 %v359_v18, 272 }
  0xbb   :  { %v891_v28 = vcombine.low %v556_v24, %v564_v25  ;;  %v892_v30 = vcombine.high %v556_v24, %v564_v25  ;;  %v619_v31 = vcombine.low %v555_v23, %v563_v26  ;;  %v620_v34 = vcombine.high %v555_v23, %v563_v26  ;;  %v1991_v23 = vld [vmem:[#allocation8 + $0x8] sm:$0xff]  ;;  %v2022_v25 = vld [vmem:[#allocation8 + $0x100] sm:$0xff] }
  0xbc   :  { %v138_v37 = vpop.permute.xlu1 %137  ;;  %v134_v38 = vpop.permute.xlu0 %133  ;;  %v3315_v24 = vsub.s32 %v687_v2, %v3116_v1  ;;  %v2023_v26 = vld [vmem:[#allocation8 + $0x108] sm:$0xff]  ;;  %v2024_v2 = vld [vmem:[#allocation8 + $0x110] sm:$0xff] }
  0xbd   :  { %v568_v44 = vmul.f32 %v3195_v39, %v138_v37  ;;  %v567_v45 = vmul.f32 %v3195_v39, %v134_v38  ;;  %v3283_v57 = vrot.slane %v891_v28, %v3276_v40  ;;  %v3286_v58 = vrot.slane %v892_v30, %v3276_v40 }
  0xbe   :  { %v3299_v5 = vrot.slane %v619_v31, %v3276_v40  ;;  %v634_v4 = vrot.slane %v620_v34, %v3276_v40  ;;  %v2743_v37 = vpack.c.bf16 %v2007_v19, %v2006_v17  ;;  %v2775_v38 = vpack.c.bf16 %v2039_v21, %v2038_v20 }
  0xbf   :  { %v907_v49 = vcombine.low %v560_v43, %v568_v44  ;;  %v908_v50 = vcombine.high %v560_v43, %v568_v44  ;;  %v635_v51 = vcombine.low %v559_v41, %v567_v45  ;;  %v636_v53 = vcombine.high %v559_v41, %v567_v45  ;;  %v2008_v45 = vld [vmem:[#allocation8 + $0x90] sm:$0xff] }
  0xc0   :  { %v157_v54 = vpop.permute.xlu1 %156  ;;  %v153_v56 = vpop.permute.xlu0 %152  ;;  %v2745_v44 = vpack.c.bf16 %v1991_v23, %v1990_v22  ;;  %v2777_v1 = vpack.c.bf16 %v2023_v26, %v2022_v25  ;;  %2744 = vmatprep.subr.bf16.mxu0 %v2743_v37  ;;  %2776 = vmatprep.subr.bf16.mxu1 %v2775_v38  ;;  %v1994_v37 = vld [vmem:[#allocation8 + $0x20] sm:$0xff]  ;;  %v1995_v38 = vld [vmem:[#allocation8 + $0x28] sm:$0xff] }
  0xc1   :  { %v3289_v60 = vrot.slane %v907_v49, %v3276_v40  ;;  %v3292_v61 = vrot.slane %v908_v50, %v3276_v40  ;;  %v3295_v62 = vrot.slane %v635_v51, %v3276_v40  ;;  %v650_v63 = vrot.slane %v636_v53, %v3276_v40  ;;  %v2041_v53 = vld [vmem:[#allocation8 + $0x198] sm:$0xff] }
  0xc2   :  { %v3318_v28 = vmul.f32 %v3171_v29, %v157_v54  ;;  %v3321_v30 = vmul.f32 %v3171_v29, %v153_v56  ;;  %v2747_v51 = vpack.c.bf16 %v2009_v46, %v2008_v45  ;;  %v1992_v54 = vld [vmem:[#allocation8 + $0x10] sm:$0xff]  ;;  %v1993_v56 = vld [vmem:[#allocation8 + $0x18] sm:$0xff]  ;;  %2746 = vmatpush3.bf16.msra.mxu0 %v2745_v44  ;;  %2778 = vmatpush3.bf16.msra.mxu1 %v2777_v1 }
  0xc3   :  { %v955_v7 = vcombine.low %v3283_v57, %v3289_v60  ;;  %v956_v12 = vcombine.high %v3283_v57, %v3289_v60  ;;  %v971_v13 = vcombine.low %v3286_v58, %v3292_v61  ;;  %v972_v14 = vcombine.high %v3286_v58, %v3292_v61 }
  0xc4   :  { %v176_v16 = vpop.permute.xlu1 %175  ;;  %v172_v18 = vpop.permute.xlu0 %171  ;;  %v683_v3 = vcombine.low %v3299_v5, %v3295_v62  ;;  %v684_v8 = vcombine.high %v3299_v5, %v3295_v62  ;;  %v699_v10 = vcombine.low %v634_v4, %v650_v63  ;;  %v700_v11 = vcombine.high %v634_v4, %v650_v63  ;;  %v2025_v5 = vld [vmem:[#allocation8 + $0x118] sm:$0xff]  ;;  %2748 = vmatprep.subr.bf16.mxu0 %v2747_v51 }
  0xc5   :  { %v576_v49 = vmul.f32 %v3181_v35, %v176_v16  ;;  %v575_v50 = vmul.f32 %v3181_v35, %v172_v18  ;;  %v2779_v18 = vpack.c.bf16 %v2041_v53, %v2040_v48  ;;  %v2749_v17 = vpack.c.bf16 %v1993_v56, %v1992_v54  ;;  %v2027_v48 = vld [vmem:[#allocation8 + $0x128] sm:$0xff]  ;;  %v2012_v56 = vld [vmem:[#allocation8 + $0xb0] sm:$0xff] }
  0xc6   :  { %v2781_v19 = vpack.c.bf16 %v2025_v5, %v2024_v2  ;;  %v3336_v20 = vrot.slane %v971_v13, %v3315_v24  ;;  %v3339_v21 = vrot.slane %v699_v10, %v3315_v24  ;;  %v3342_v22 = vrot.slane %v700_v11, %v3315_v24  ;;  %v2010_v13 = vld [vmem:[#allocation8 + $0xa0] sm:$0xff]  ;;  %v2011_v10 = vld [vmem:[#allocation8 + $0xa8] sm:$0xff] }
  0xc7   :  { %v3345_v23 = vrot.slane %v972_v14, %v3315_v24  ;;  %2780 = vmatprep.subr.bf16.mxu1 %v2779_v18  ;;  %v3359_v14 = vrot.slane %v684_v8, %v3315_v24  ;;  %2750 = vmatpush3.bf16.msra.mxu0 %v2749_v17  ;;  %v2026_v8 = vld [vmem:[#allocation8 + $0x120] sm:$0xff] }
  0xc8   :  { %v195_v31 = vpop.permute.xlu1 %194  ;;  %v191_v34 = vpop.permute.xlu0 %190  ;;  %4027 = vst [vmem:[#allocation13_spill] sm:$0xff] %v3336_v20  ;;  %2782 = vmatpush3.bf16.msra.mxu1 %v2781_v19 }
  0xc9   :  { %v580_v41 = vmul.f32 %v3184_v36, %v195_v31  ;;  %v3325_v43 = vmul.f32 %v3184_v36, %v191_v34  ;;  %v2042_v31 = vld [vmem:[#allocation8 + $0x1a0] sm:$0xff]  ;;  %v3365_v34 = vrot.slane %v956_v12, %v3315_v24  ;;  %v2753_v12 = vpack.c.bf16 %v1995_v38, %v1994_v37 }
  0xcb   :  { %v923_v58 = vcombine.low %v3318_v28, %v580_v41  ;;  %v924_v61 = vcombine.high %v3318_v28, %v580_v41  ;;  %v651_v62 = vcombine.low %v3321_v30, %v3325_v43  ;;  %v652_v63 = vcombine.high %v3321_v30, %v3325_v43 }
  0xcc   :  { %v214_v4 = vpop.permute.xlu1 %213  ;;  %v210_v16 = vpop.permute.xlu0 %209  ;;  %v3350_v28 = vrot.slane %v683_v3, %v3315_v24  ;;  %v3353_v30 = vrot.slane %v955_v7, %v3315_v24  ;;  %v2751_v3 = vpack.c.bf16 %v2011_v10, %v2010_v13  ;;  %v2043_v7 = vld [vmem:[#allocation8 + $0x1a8] sm:$0xff] }
  0xcd   :  { %v584_v25 = vmul.f32 %v3198_v42, %v214_v4  ;;  %v583_v26 = vmul.f32 %v3198_v42, %v210_v16  ;;  %v3356_v11 = vrot.slane %v923_v58, %v3276_v40  ;;  %v938_v51 = vrot.slane %v924_v61, %v3276_v40  ;;  %v2013_v58 = vld [vmem:[#allocation8 + $0xb8] sm:$0xff] }
  0xce   :  { %4028 = vst [vmem:[#allocation14_spill] sm:$0xff] %v3350_v28  ;;  %4029 = vst [vmem:[#allocation15_spill] sm:$0xff] %v3353_v30  ;;  %v659_v57 = vrot.slane %v651_v62, %v3276_v40  ;;  %2752 = vmatprep.subr.bf16.mxu0 %v2751_v3  ;;  %v2783_v60 = vpack.c.bf16 %v2043_v7, %v2042_v31  ;;  %v666_v2 = vrot.slane %v652_v63, %v3276_v40 }
  0xcf   :  { %v939_v41 = vcombine.low %v576_v49, %v584_v25  ;;  %v940_v43 = vcombine.high %v576_v49, %v584_v25  ;;  %v667_v44 = vcombine.low %v575_v50, %v583_v26  ;;  %v668_v1 = vcombine.high %v575_v50, %v583_v26  ;;  %2754 = vmatpush3.bf16.msra.mxu0 %v2753_v12 }
  0xd0   :  { %v233_v45 = vpop.permute.xlu1 %232  ;;  %v229_v46 = vpop.permute.xlu0 %228  ;;  %2784 = vmatprep.subr.bf16.mxu1 %v2783_v60  ;;  %v2785_v61 = vpack.c.bf16 %v2027_v48, %v2026_v8  ;;  %v2755_v5 = vpack.c.bf16 %v2013_v58, %v2012_v56 }
  0xd1   :  { %v947_v53 = vrot.slane %v939_v41, %v3276_v40  ;;  %v954_v54 = vrot.slane %v940_v43, %v3276_v40  ;;  %v675_v49 = vrot.slane %v667_v44, %v3276_v40  ;;  %v682_v50 = vrot.slane %v668_v1, %v3276_v40 }
  0xd2   :  { %2786 = vmatpush3.bf16.msra.mxu1 %v2785_v61  ;;  %v588_v31 = vmul.f32 %v3210_v47, %v233_v45  ;;  %v3378_v63 = vmul.f32 %v3210_v47, %v229_v46  ;;  %2756 = vmatprep.subr.bf16.mxu0 %v2755_v5  ;;  %v2044_v61 = vld [vmem:[#allocation8 + $0x1b0] sm:$0xff]  ;;  %v2047_v45 = vld [vmem:[#allocation8 + $0x1c8] sm:$0xff] }
  0xd3   :  { %v987_v62 = vcombine.low %v3356_v11, %v947_v53  ;;  %v988_v4 = vcombine.high %v3356_v11, %v947_v53  ;;  %v1003_v16 = vcombine.low %v938_v51, %v954_v54  ;;  %v1004_v18 = vcombine.high %v938_v51, %v954_v54 }
  0xd4   :  { %v252_v17 = vpop.permute.xlu1 %251  ;;  %v248_v19 = vpop.permute.xlu0 %247  ;;  %v715_v25 = vcombine.low %v659_v57, %v675_v49  ;;  %v716_v26 = vcombine.high %v659_v57, %v675_v49  ;;  %v731_v13 = vcombine.low %v666_v2, %v682_v50  ;;  %v732_v10 = vcombine.high %v666_v2, %v682_v50 }
  0xd5   :  { %v3381_v3 = vrot.slane %v1003_v16, %v3315_v24  ;;  %v3384_v7 = vrot.slane %v1004_v18, %v3315_v24  ;;  %v3396_v41 = vrot.slane %v987_v62, %v3315_v24  ;;  %v3426_v16 = vrot.slane %v988_v4, %v3315_v24 }
  0xd6   :  { %v3387_v11 = vrot.slane %v731_v13, %v3315_v24  ;;  %v3390_v37 = vrot.slane %v732_v10, %v3315_v24  ;;  %v3393_v38 = vrot.slane %v715_v25, %v3315_v24  ;;  %v3403_v46 = vrot.slane %v716_v26, %v3315_v24  ;;  %v2045_v13 = vld [vmem:[#allocation8 + $0x1b8] sm:$0xff]  ;;  %v1996_v10 = vld [vmem:[#allocation8 + $0x30] sm:$0xff]  ;;  %v2014_v25 = vld [vmem:[#allocation8 + $0xc0] sm:$0xff] }
  0xd7   :  { %4030 = vst [vmem:[#allocation16_spill] sm:$0xff] %v3381_v3  ;;  %4033 = vst [vmem:[#allocation19_spill] sm:$0xff] %v3396_v41  ;;  %v1024_v1 = vcombine.high %v3336_v20, %v3381_v3  ;;  %v1020_v53 = vcombine.high %v3353_v30, %v3396_v41  ;;  %v2046_v26 = vld [vmem:[#allocation8 + $0x1c0] sm:$0xff]  ;;  %v2051_v30 = vld [vmem:[#allocation8 + $0x1e8] sm:$0xff] }
  0xd8   :  { %4031 = vst [vmem:[#allocation17_spill] sm:$0xff] %v3387_v11  ;;  %4032 = vst [vmem:[#allocation18_spill] sm:$0xff] %v3393_v38  ;;  %v271_v43 = vpop.permute.xlu1 %270  ;;  %v267_v44 = vpop.permute.xlu0 %266  ;;  %v752_v57 = vcombine.high %v3339_v21, %v3387_v11  ;;  %v753_v60 = vcombine.low %v3342_v22, %v3390_v37  ;;  %v748_v12 = vcombine.high %v3350_v28, %v3393_v38  ;;  %v1998_v3 = vld [vmem:[#allocation8 + $0x40] sm:$0xff] }
  0xd9   :  { %v596_v48 = vmul.f32 %v3222_v55, %v271_v43  ;;  %v595_v51 = vmul.f32 %v3222_v55, %v267_v44  ;;  %1781 = vrot.lane.b32.xlu1 %v1024_v1, %s3035_s2  ;;  %v591_v43 = vmul.f32 %v3218_v52, %v248_v19  ;;  %v2028_v19 = vld [vmem:[#allocation8 + $0x130] sm:$0xff]  ;;  %v2050_v41 = vld [vmem:[#allocation8 + $0x1e0] sm:$0xff] }
  0xda   :  { %1733 = vrot.lane.b32.xlu0 %v752_v57, %s3035_s2  ;;  %v2029_v57 = vld [vmem:[#allocation8 + $0x138] sm:$0xff] }
  0xdb   :  { %v1027_v50 = vcombine.low %v588_v31, %v596_v48  ;;  %v1028_v56 = vcombine.high %v588_v31, %v596_v48  ;;  %v755_v58 = vcombine.low %v3378_v63, %v595_v51  ;;  %v756_v2 = vcombine.high %v3378_v63, %v595_v51  ;;  %v1997_v31 = vld [vmem:[#allocation8 + $0x38] sm:$0xff] }
  0xdc   :  { %v290_v5 = vpop.permute.xlu1 %289  ;;  %v286_v62 = vpop.permute.xlu0 %285  ;;  %v592_v63 = vmul.f32 %v3218_v52, %v252_v17 }
  0xdd   :  { %v3437_v44 = vrot.slane %v1027_v50, %v3276_v40  ;;  %v3440_v4 = vrot.slane %v1028_v56, %v3276_v40  ;;  %v600_v1 = vmul.f32 %v3227_v59, %v290_v5  ;;  %v599_v48 = vmul.f32 %v3227_v59, %v286_v62  ;;  %1741 = vrot.lane.b32.xlu1 %v753_v60, %s3036_s25  ;;  %v2015_v60 = vld [vmem:[#allocation8 + $0xc8] sm:$0xff] }
  0xde   :  { %1709 = vrot.lane.b32.xlu0 %v748_v12, %s3035_s2  ;;  %v2787_v5 = vpack.c.bf16 %v2045_v13, %v2044_v61  ;;  %v2757_v62 = vpack.c.bf16 %v1997_v31, %v1996_v10  ;;  %v1999_v12 = vld [vmem:[#allocation8 + $0x48] sm:$0xff]  ;;  %v3455_v20 = vrot.slane %v755_v58, %v3276_v40  ;;  %v3458_v50 = vrot.slane %v756_v2, %v3276_v40 }
  0xdf   :  { %v1043_v18 = vcombine.low %v592_v63, %v600_v1  ;;  %v1044_v51 = vcombine.high %v592_v63, %v600_v1  ;;  %v771_v8 = vcombine.low %v591_v43, %v599_v48  ;;  %v772_v49 = vcombine.high %v591_v43, %v599_v48 }
  0xe0   :  { %v309_v17 = vpop.permute.xlu1 %308  ;;  %v305_v54 = vpop.permute.xlu0 %304  ;;  %2788 = vmatprep.subr.bf16.mxu1 %v2787_v5  ;;  %2758 = vmatpush3.bf16.msra.mxu0 %v2757_v62  ;;  %v2789_v61 = vpack.c.bf16 %v2029_v57, %v2028_v19  ;;  %v4034_v58 = vcombine.low %v3345_v23, %v3384_v7  ;;  %v2759_v2 = vpack.c.bf16 %v2015_v60, %v2014_v25  ;;  %v2030_v57 = vld [vmem:[#allocation8 + $0x140] sm:$0xff]  ;;  %v2016_v5 = vld [vmem:[#allocation8 + $0xd0] sm:$0xff]  ;;  %v2017_v62 = vld [vmem:[#allocation8 + $0xd8] sm:$0xff] }
  0xe1   :  { %v3461_v13 = vrot.slane %v1043_v18, %v3276_v40  ;;  %v3464_v10 = vrot.slane %v1044_v51, %v3276_v40  ;;  %v3467_v31 = vrot.slane %v771_v8, %v3276_v40  ;;  %v3470_v63 = vrot.slane %v772_v49, %v3276_v40  ;;  %v2049_v60 = vld [vmem:[#allocation8 + $0x1d8] sm:$0xff] }
  0xe2   :  { %1789 = vrot.lane.b32.xlu1 %v4034_v58, %s3036_s25  ;;  %1757 = vrot.lane.b32.xlu0 %v1020_v53, %s3035_s2  ;;  %v2791_v18 = vpack.c.bf16 %v2047_v45, %v2046_v26  ;;  %v2761_v43 = vpack.c.bf16 %v1999_v12, %v1998_v3  ;;  %v2031_v53 = vld [vmem:[#allocation8 + $0x148] sm:$0xff]  ;;  %v4035_v12 = vcombine.high %v3342_v22, %v3390_v37  ;;  %v2032_v58 = vld [vmem:[#allocation8 + $0x150] sm:$0xff]  ;;  %v2018_v22 = vld [vmem:[#allocation8 + $0xe0] sm:$0xff] }
  0xe3   :  { %2790 = vmatpush3.bf16.msra.mxu1 %v2789_v61  ;;  %v1107_v49 = vcombine.low %v3440_v4, %v3464_v10  ;;  %v1108_v48 = vcombine.high %v3440_v4, %v3464_v10  ;;  %v819_v3 = vcombine.low %v3455_v20, %v3467_v31  ;;  %v835_v25 = vcombine.low %v3458_v50, %v3470_v63  ;;  %v2048_v4 = vld [vmem:[#allocation8 + $0x1d0] sm:$0xff]  ;;  %v2001_v10 = vld [vmem:[#allocation8 + $0x58] sm:$0xff]  ;;  %v2019_v37 = vld [vmem:[#allocation8 + $0xe8] sm:$0xff] }
  0xe4   :  { %v328_v51 = vpop.permute.xlu1 %327  ;;  %v324_v19 = vpop.permute.xlu0 %323  ;;  %v836_v26 = vcombine.high %v3458_v50, %v3470_v63  ;;  %2760 = vmatprep.subr.bf16.mxu0 %v2759_v2  ;;  %v2000_v61 = vld [vmem:[#allocation8 + $0x50] sm:$0xff]  ;;  %v3498_v56 = vmul.f32 %v3238_v0, %v309_v17  ;;  %v3501_v8 = vmul.f32 %v3238_v0, %v305_v54  ;;  %v4036_v63 = vcombine.low %v3359_v14, %v3403_v46  ;;  %v2033_v2 = vld [vmem:[#allocation8 + $0x158] sm:$0xff] }
  0xe5   :  { %v3504_v50 = vmul.f32 %v3245_v6, %v328_v51  ;;  %v3514_v1 = vrot.slane %v1107_v49, %v3315_v24  ;;  %2792 = vmatprep.subr.bf16.mxu1 %v2791_v18  ;;  %2762 = vmatpush3.bf16.msra.mxu0 %v2761_v43  ;;  %v2793_v54 = vpack.c.bf16 %v2031_v53, %v2030_v57  ;;  %v2002_v43 = vld [vmem:[#allocation8 + $0x60] sm:$0xff]  ;;  %v2003_v57 = vld [vmem:[#allocation8 + $0x68] sm:$0xff] }
  0xe6   :  { %1749 = vrot.lane.b32.xlu1 %v4035_v12, %s3037_s26  ;;  %1717 = vrot.lane.b32.xlu0 %v4036_v63, %s3036_s25  ;;  %v3511_v12 = vmul.f32 %v3245_v6, %v324_v19  ;;  %v2763_v63 = vpack.c.bf16 %v2017_v62, %v2016_v5  ;;  %v2795_v28 = vpack.c.bf16 %v2049_v60, %v2048_v4  ;;  %v2035_v4 = vld [vmem:[#allocation8 + $0x168] sm:$0xff]  ;;  %v2020_v60 = vld [vmem:[#allocation8 + $0xf0] sm:$0xff] }
  0xe7   :  { %v4037_v19 = vcombine.high %v3345_v23, %v3384_v7  ;;  %2794 = vmatpush3.bf16.msra.mxu1 %v2793_v54  ;;  %v2765_v49 = vpack.c.bf16 %v2001_v10, %v2000_v61  ;;  %v2797_v11 = vpack.c.bf16 %v2033_v2, %v2032_v58  ;;  %v2767_v18 = vpack.c.bf16 %v2019_v37, %v2018_v22  ;;  %v2034_v7 = vld [vmem:[#allocation8 + $0x160] sm:$0xff]  ;;  %v2053_v22 = vld [vmem:[#allocation8 + $0x1f8] sm:$0xff] }
  0xe8   :  { %v347_v45 = vpop.permute.xlu1 %346  ;;  %v343_v17 = vpop.permute.xlu0 %342  ;;  %v4038_v23 = vcombine.low %v3365_v34, %v3426_v16  ;;  %v3535_v58 = vrot.slane %v835_v25, %v3315_v24  ;;  %2764 = vmatprep.subr.bf16.mxu0 %v2763_v63  ;;  %2796 = vmatprep.subr.bf16.mxu1 %v2795_v28  ;;  %v2799_v2 = vpack.c.bf16 %v2051_v30, %v2050_v41  ;;  %v2036_v63 = vld [vmem:[#allocation8 + $0x170] sm:$0xff] }
  0xe9   :  { %v612_v51 = vmul.f32 %v3248_v9, %v347_v45  ;;  %v3518_v38 = vmul.f32 %v3248_v9, %v343_v17  ;;  %v3541_v37 = vrot.slane %v836_v26, %v3315_v24  ;;  %v3544_v17 = vrot.slane %v819_v3, %v3315_v24  ;;  %2766 = vmatpush3.bf16.msra.mxu0 %v2765_v49  ;;  %v2005_v26 = vld [vmem:[#allocation8 + $0x78] sm:$0xff] }
  0xea   :  { %1797 = vrot.lane.b32.xlu1 %v4037_v19, %s3037_s26  ;;  %1765 = vrot.lane.b32.xlu0 %v4038_v23, %s3036_s25  ;;  %v4039_v25 = vcombine.low %v3437_v44, %v3461_v13  ;;  %v4040_v41 = vcombine.high %v3365_v34, %v3426_v16  ;;  %v2801_v3 = vpack.c.bf16 %v2035_v4, %v2034_v7  ;;  %v2037_v19 = vld [vmem:[#allocation8 + $0x178] sm:$0xff] }
  0xeb   :  { %v1059_v53 = vcombine.low %v3498_v56, %v612_v51  ;;  %v1060_v45 = vcombine.high %v3498_v56, %v612_v51  ;;  %v787_v5 = vcombine.low %v3501_v8, %v3518_v38  ;;  %v788_v62 = vcombine.high %v3501_v8, %v3518_v38  ;;  %v2021_v38 = vld [vmem:[#allocation8 + $0xf8] sm:$0xff]  ;;  %v2052_v8 = vld [vmem:[#allocation8 + $0x1f0] sm:$0xff]  ;;  %2798 = vmatpush3.bf16.msra.mxu1 %v2797_v11 }
  0xec   :  { %v366_v61 = vpop.permute.xlu1 %365  ;;  %v362_v10 = vpop.permute.xlu0 %361  ;;  %v3538_v56 = vrot.slane %v1108_v48, %v3315_v24  ;;  %v3550_v54 = vrot.slane %v4039_v25, %v3315_v24  ;;  %v2769_v48 = vpack.c.bf16 %v2003_v57, %v2002_v43  ;;  %v2004_v51 = vld [vmem:[#allocation8 + $0x70] sm:$0xff]  ;;  %v4041_v49 = vcombine.high %v3359_v14, %v3403_v46  ;;  %2768 = vmatprep.subr.bf16.mxu0 %v2767_v18 }
  0xed   :  { %v616_v28 = vmul.f32 %v3255_v15, %v366_v61  ;;  %v615_v30 = vmul.f32 %v3255_v15, %v362_v10  ;;  %v4042_v43 = vcombine.high %v3455_v20, %v3467_v31  ;;  %v2771_v23 = vpack.c.bf16 %v2021_v38, %v2020_v60  ;;  %2800 = vmatprep.subr.bf16.mxu1 %v2799_v2 }
  0xee   :  { %1773 = vrot.lane.b32.xlu1 %v4040_v41, %s3037_s26  ;;  %1725 = vrot.lane.b32.xlu0 %v4041_v49, %s3037_s26  ;;  %v2803_v34 = vpack.c.bf16 %v2053_v22, %v2052_v8  ;;  %v1067_v46 = vrot.slane %v1059_v53, %v3276_v40  ;;  %v1074_v20 = vrot.slane %v1060_v45, %v3276_v40 }
  0xef   :  { %v3566_v57 = vrot.slane %v4042_v43, %v3315_v24  ;;  %v1075_v11 = vcombine.low %v3504_v50, %v616_v28  ;;  %v1076_v16 = vcombine.high %v3504_v50, %v616_v28  ;;  %v803_v7 = vcombine.low %v3511_v12, %v615_v30  ;;  %2770 = vmatpush3.bf16.msra.mxu0 %v2769_v48 }
  0xf0   :  { %v804_v4 = vcombine.high %v3511_v12, %v615_v30  ;;  %v89_v61 = vpop.permute.xlu1 %88  ;;  %v85_v14 = vpop.permute.xlu0 %84  ;;  %v2773_v31 = vpack.c.bf16 %v2005_v26, %v2004_v51  ;;  %v2805_v18 = vpack.c.bf16 %v2037_v19, %v2036_v63  ;;  %2802 = vmatpush3.bf16.msra.mxu1 %v2801_v3  ;;  %v795_v12 = vrot.slane %v787_v5, %v3276_v40 }
  0xf1   :  { %v1083_v60 = vrot.slane %v1075_v11, %v3276_v40  ;;  %v1090_v10 = vrot.slane %v1076_v16, %v3276_v40  ;;  %v811_v50 = vrot.slane %v803_v7, %v3276_v40  ;;  %v802_v2 = vrot.slane %v788_v62, %v3276_v40  ;;  %2772 = vmatprep.subr.bf16.mxu0 %v2771_v23 }
  0xf2   :  { %v818_v38 = vrot.slane %v804_v4, %v3276_v40  ;;  %v4043_v53 = vcombine.high %v3437_v44, %v3461_v13  ;;  %2804 = vmatprep.subr.bf16.mxu1 %v2803_v34  ;;  %v558_v62 = vmul.f32 %v3168_v27, %v89_v61  ;;  %v557_v26 = vmul.f32 %v3168_v27, %v85_v14 }
  0xf3   :  { %v1123_v8 = vcombine.low %v1067_v46, %v1083_v60  ;;  %v1124_v22 = vcombine.high %v1067_v46, %v1083_v60  ;;  %v1139_v25 = vcombine.low %v1074_v20, %v1090_v10  ;;  %v1140_v48 = vcombine.high %v1074_v20, %v1090_v10  ;;  %2774 = vmatpush3.bf16.msra.mxu0 %v2773_v31 }
  0xf4   :  { %v3584_v45 = vrot.slane %v4043_v53, %v3315_v24  ;;  %v108_v51 = vpop.permute.xlu1 %107  ;;  %v104_v28 = vpop.permute.xlu0 %103  ;;  %v851_v30 = vcombine.low %v795_v12, %v811_v50  ;;  %v852_v41 = vcombine.high %v795_v12, %v811_v50  ;;  %v867_v3 = vcombine.low %v802_v2, %v818_v38  ;;  %2806 = vmatpush3.bf16.msra.mxu1 %v2805_v18 }
  0xf5   :  { %v868_v5 = vcombine.high %v802_v2, %v818_v38  ;;  %v3589_v44 = vrot.slane %v1139_v25, %v3315_v24  ;;  %v3592_v13 = vrot.slane %v1140_v48, %v3315_v24  ;;  %v3604_v43 = vrot.slane %v1123_v8, %v3315_v24 }
  0xf6   :  { %v3595_v63 = vrot.slane %v867_v3, %v3315_v24  ;;  %v3601_v49 = vrot.slane %v851_v30, %v3315_v24  ;;  %v3611_v16 = vrot.slane %v852_v41, %v3315_v24  ;;  %v3632_v53 = vrot.slane %v1124_v22, %v3315_v24 }
  0xf7   :  { %v3598_v19 = vrot.slane %v868_v5, %v3315_v24  ;;  %v1160_v34 = vcombine.high %v3514_v1, %v3589_v44  ;;  %v1161_v11 = vcombine.low %v3538_v56, %v3592_v13  ;;  %v1162_v7 = vcombine.high %v3538_v56, %v3592_v13 }
  0xf8   :  { %v127_v27 = vpop.permute.xlu1 %126  ;;  %v123_v23 = vpop.permute.xlu0 %122  ;;  %v888_v14 = vcombine.high %v3535_v58, %v3595_v63  ;;  %v884_v20 = vcombine.high %v3544_v17, %v3601_v49  ;;  %v1156_v31 = vcombine.high %v3550_v54, %v3604_v43  ;;  %v886_v8 = vcombine.high %v3566_v57, %v3611_v16 }
  0xf9   :  { %v566_v4 = vmul.f32 %v3178_v33, %v127_v27  ;;  %v565_v61 = vmul.f32 %v3178_v33, %v123_v23  ;;  %v889_v46 = vcombine.low %v3541_v37, %v3598_v19  ;;  %1783 = vrot.lane.b32.xlu1 %v1160_v34, %s3035_s2  ;;  %v890_v18 = vcombine.high %v3541_v37, %v3598_v19 }
  0xfa   :  { %v885_v33 = vcombine.low %v3566_v57, %v3611_v16  ;;  %1735 = vrot.lane.b32.xlu0 %v888_v14, %s3035_s2  ;;  %v1159_v37 = vcombine.low %v3514_v1, %v3589_v44  ;;  %v887_v25 = vcombine.low %v3535_v58, %v3595_v63  ;;  %v562_v48 = vmul.f32 %v3175_v32, %v108_v51  ;;  %v2069_v58 = vld [vmem:[#allocation8 + $0x278] sm:$0xff]  ;;  %v2134_v63 = vld [vmem:[#allocation8 + $0x480] sm:$0xff] }
  0xfb   :  { %v1435_v60 = vcombine.low %v558_v62, %v566_v4  ;;  %v1436_v10 = vcombine.high %v558_v62, %v566_v4  ;;  %v1163_v50 = vcombine.low %v557_v26, %v565_v61  ;;  %v1164_v38 = vcombine.high %v557_v26, %v565_v61 }
  0xfc   :  { %v146_v12 = vpop.permute.xlu1 %145  ;;  %v142_v2 = vpop.permute.xlu0 %141  ;;  %v561_v30 = vmul.f32 %v3175_v32, %v104_v28  ;;  %v1157_v22 = vcombine.low %v3584_v45, %v3632_v53  ;;  %v1158_v5 = vcombine.high %v3584_v45, %v3632_v53  ;;  %v883_v62 = vcombine.low %v3544_v17, %v3601_v49 }
  0xfd   :  { %v570_v41 = vmul.f32 %v3195_v39, %v146_v12  ;;  %v569_v3 = vmul.f32 %v3195_v39, %v142_v2  ;;  %1743 = vrot.lane.b32.xlu1 %v889_v46, %s3036_s25  ;;  %v1155_v32 = vcombine.low %v3550_v54, %v3604_v43  ;;  %v3655_v23 = vrot.slane %v1435_v60, %v3276_v40 }
  0xfe   :  { %1711 = vrot.lane.b32.xlu0 %v884_v20, %s3035_s2  ;;  %v1450_v34 = vrot.slane %v1436_v10, %v3276_v40  ;;  %v3668_v46 = vrot.slane %v1163_v50, %v3276_v40  ;;  %v1178_v20 = vrot.slane %v1164_v38, %v3276_v40 }
  0xff   :  { %v1451_v51 = vcombine.low %v562_v48, %v570_v41  ;;  %v1452_v28 = vcombine.high %v562_v48, %v570_v41  ;;  %v1179_v26 = vcombine.low %v561_v30, %v569_v3  ;;  %v1180_v39 = vcombine.high %v561_v30, %v569_v3  ;;  %v2070_v30 = vld [vmem:[#allocation8 + $0x280] sm:$0xff] }
 0x100   :  { %v165_v19 = vpop.permute.xlu1 %164  ;;  %v161_v27 = vpop.permute.xlu0 %160  ;;  %v2102_v3 = vld [vmem:[#allocation8 + $0x380] sm:$0xff] }
 0x101   :  { %v3659_v45 = vrot.slane %v1451_v51, %v3276_v40  ;;  %v1466_v4 = vrot.slane %v1452_v28, %v3276_v40  ;;  %v3663_v61 = vrot.slane %v1179_v26, %v3276_v40  ;;  %v1194_v14 = vrot.slane %v1180_v39, %v3276_v40  ;;  %1791 = vrot.lane.b32.xlu1 %v1161_v11, %s3036_s25  ;;  %v2103_v51 = vld [vmem:[#allocation8 + $0x388] sm:$0xff] }
 0x102   :  { %1759 = vrot.lane.b32.xlu0 %v1156_v31, %s3035_s2  ;;  %v2071_v31 = vld [vmem:[#allocation8 + $0x288] sm:$0xff] }
 0x103   :  { %v1499_v60 = vcombine.low %v3655_v23, %v3659_v45  ;;  %v1500_v10 = vcombine.high %v3655_v23, %v3659_v45  ;;  %v1515_v12 = vcombine.low %v1450_v34, %v1466_v4  ;;  %v1516_v2 = vcombine.high %v1450_v34, %v1466_v4 }
 0x104   :  { %v184_v53 = vpop.permute.xlu1 %183  ;;  %v180_v48 = vpop.permute.xlu0 %179  ;;  %v1227_v11 = vcombine.low %v3668_v46, %v3663_v61  ;;  %v1228_v50 = vcombine.high %v3668_v46, %v3663_v61  ;;  %v1243_v38 = vcombine.low %v1178_v20, %v1194_v14  ;;  %v1244_v41 = vcombine.high %v1178_v20, %v1194_v14 }
 0x105   :  { %1751 = vrot.lane.b32.xlu1 %v890_v18, %s3037_s26  ;;  %v2807_v39 = vpack.c.bf16 %v2071_v31, %v2070_v30  ;;  %v2839_v23 = vpack.c.bf16 %v2103_v51, %v2102_v3  ;;  %v574_v34 = vmul.f32 %v3171_v29, %v165_v19  ;;  %v573_v45 = vmul.f32 %v3171_v29, %v161_v27 }
 0x106   :  { %1719 = vrot.lane.b32.xlu0 %v885_v33, %s3036_s25  ;;  %v578_v29 = vmul.f32 %v3181_v35, %v184_v53  ;;  %v577_v27 = vmul.f32 %v3181_v35, %v180_v48  ;;  %v3701_v56 = vrot.slane %v1515_v12, %v3315_v24  ;;  %v3704_v13 = vrot.slane %v1243_v38, %v3315_v24 }
 0x107   :  { %2808 = vmatprep.subr.bf16.mxu0 %v2807_v39  ;;  %2840 = vmatprep.subr.bf16.mxu1 %v2839_v23  ;;  %v3710_v35 = vrot.slane %v1516_v2, %v3315_v24  ;;  %v3718_v12 = vrot.slane %v1499_v60, %v3315_v24 }
 0x108   :  { %v203_v28 = vpop.permute.xlu1 %202  ;;  %v199_v26 = vpop.permute.xlu0 %198 }
 0x109   :  { %v582_v4 = vmul.f32 %v3184_v36, %v203_v28  ;;  %v581_v61 = vmul.f32 %v3184_v36, %v199_v26  ;;  %1799 = vrot.lane.b32.xlu1 %v1162_v7, %s3037_s26  ;;  %v3707_v7 = vrot.slane %v1244_v41, %v3315_v24  ;;  %v3727_v26 = vrot.slane %v1228_v50, %v3315_v24 }
 0x10a   :  { %1767 = vrot.lane.b32.xlu0 %v1157_v22, %s3036_s25 }
 0x10b   :  { %v1467_v18 = vcombine.low %v574_v34, %v582_v4  ;;  %v1468_v33 = vcombine.high %v574_v34, %v582_v4  ;;  %v1195_v14 = vcombine.low %v573_v45, %v581_v61  ;;  %v1196_v46 = vcombine.high %v573_v45, %v581_v61 }
 0x10c   :  { %v222_v20 = vpop.permute.xlu1 %221  ;;  %v218_v19 = vpop.permute.xlu0 %217 }
 0x10d   :  { %v586_v36 = vmul.f32 %v3198_v42, %v222_v20  ;;  %v585_v30 = vmul.f32 %v3198_v42, %v218_v19  ;;  %1775 = vrot.lane.b32.xlu1 %v1158_v5, %s3037_s26  ;;  %v1475_v57 = vrot.slane %v1467_v18, %v3276_v40  ;;  %v1482_v16 = vrot.slane %v1468_v33, %v3276_v40 }
 0x10e   :  { %1727 = vrot.lane.b32.xlu0 %v886_v8, %s3037_s26  ;;  %v3715_v8 = vrot.slane %v1227_v11, %v3315_v24  ;;  %v1203_v51 = vrot.slane %v1195_v14, %v3276_v40  ;;  %v1210_v28 = vrot.slane %v1196_v46, %v3276_v40  ;;  %v3730_v11 = vrot.slane %v1500_v10, %v3315_v24 }
 0x10f   :  { %v1483_v42 = vcombine.low %v578_v29, %v586_v36  ;;  %v1484_v22 = vcombine.high %v578_v29, %v586_v36  ;;  %v1211_v5 = vcombine.low %v577_v27, %v585_v30  ;;  %v1212_v53 = vcombine.high %v577_v27, %v585_v30 }
 0x110   :  { %v241_v48 = vpop.permute.xlu1 %240  ;;  %v237_v31 = vpop.permute.xlu0 %236 }
 0x111   :  { %v1491_v38 = vrot.slane %v1483_v42, %v3276_v40  ;;  %v1498_v2 = vrot.slane %v1484_v22, %v3276_v40  ;;  %v1219_v41 = vrot.slane %v1211_v5, %v3276_v40  ;;  %v1226_v3 = vrot.slane %v1212_v53, %v3276_v40 }
 0x112   :  { %v590_v14 = vmul.f32 %v3210_v47, %v241_v48  ;;  %v589_v46 = vmul.f32 %v3210_v47, %v237_v31 }
 0x113   :  { %v1531_v60 = vcombine.low %v1475_v57, %v1491_v38  ;;  %v1532_v39 = vcombine.high %v1475_v57, %v1491_v38  ;;  %v1547_v23 = vcombine.low %v1482_v16, %v1498_v2  ;;  %v1548_v34 = vcombine.high %v1482_v16, %v1498_v2 }
 0x114   :  { %v260_v45 = vpop.permute.xlu1 %259  ;;  %v256_v4 = vpop.permute.xlu0 %255  ;;  %v1259_v61 = vcombine.low %v1203_v51, %v1219_v41  ;;  %v1260_v18 = vcombine.high %v1203_v51, %v1219_v41  ;;  %v1275_v33 = vcombine.low %v1210_v28, %v1226_v3  ;;  %v1276_v20 = vcombine.high %v1210_v28, %v1226_v3 }
 0x115   :  { %v3735_v50 = vrot.slane %v1547_v23, %v3315_v24  ;;  %v3738_v10 = vrot.slane %v1548_v34, %v3315_v24  ;;  %v3750_v36 = vrot.slane %v1531_v60, %v3315_v24 }
 0x116   :  { %v3741_v19 = vrot.slane %v1275_v33, %v3315_v24  ;;  %v3744_v29 = vrot.slane %v1276_v20, %v3315_v24  ;;  %v3747_v27 = vrot.slane %v1259_v61, %v3315_v24  ;;  %v3757_v5 = vrot.slane %v1260_v18, %v3315_v24 }
 0x117   :  { %v1568_v42 = vcombine.high %v3701_v56, %v3735_v50  ;;  %v1569_v22 = vcombine.low %v3710_v35, %v3738_v10  ;;  %v1570_v53 = vcombine.high %v3710_v35, %v3738_v10  ;;  %v1564_v2 = vcombine.high %v3718_v12, %v3750_v36 }
 0x118   :  { %v279_v30 = vpop.permute.xlu1 %278  ;;  %v275_v47 = vpop.permute.xlu0 %274  ;;  %v1296_v57 = vcombine.high %v3704_v13, %v3741_v19  ;;  %v1297_v16 = vcombine.low %v3707_v7, %v3744_v29  ;;  %v1292_v38 = vcombine.high %v3715_v8, %v3747_v27  ;;  %v1298_v41 = vcombine.high %v3707_v7, %v3744_v29 }
 0x119   :  { %v598_v48 = vmul.f32 %v3222_v55, %v279_v30  ;;  %v597_v31 = vmul.f32 %v3222_v55, %v275_v47  ;;  %1877 = vrot.lane.b32.xlu1 %v1568_v42, %s3035_s2  ;;  %v1293_v55 = vcombine.low %v3727_v26, %v3757_v5  ;;  %v1546_v61 = vrot.slane %v1532_v39, %v3315_v24 }
 0x11a   :  { %1829 = vrot.lane.b32.xlu0 %v1296_v57, %s3035_s2  ;;  %v1294_v18 = vcombine.high %v3727_v26, %v3757_v5  ;;  %v1567_v33 = vcombine.low %v3701_v56, %v3735_v50  ;;  %v1295_v7 = vcombine.low %v3704_v13, %v3741_v19  ;;  %v594_v20 = vmul.f32 %v3218_v52, %v260_v45 }
 0x11b   :  { %v1571_v3 = vcombine.low %v590_v14, %v598_v48  ;;  %v1572_v51 = vcombine.high %v590_v14, %v598_v48  ;;  %v1299_v28 = vcombine.low %v589_v46, %v597_v31  ;;  %v1300_v60 = vcombine.high %v589_v46, %v597_v31 }
 0x11c   :  { %v298_v23 = vpop.permute.xlu1 %297  ;;  %v294_v34 = vpop.permute.xlu0 %293  ;;  %v593_v14 = vmul.f32 %v3218_v52, %v256_v4  ;;  %v1565_v39 = vcombine.low %v3730_v11, %v1546_v61  ;;  %v1566_v30 = vcombine.high %v3730_v11, %v1546_v61  ;;  %v4056_v56 = vcombine.low %v3715_v8, %v3747_v27 }
 0x11d   :  { %v602_v46 = vmul.f32 %v3227_v59, %v298_v23  ;;  %v601_v29 = vmul.f32 %v3227_v59, %v294_v34  ;;  %1837 = vrot.lane.b32.xlu1 %v1297_v16, %s3036_s25  ;;  %v1579_v57 = vrot.slane %v1571_v3, %v3276_v40  ;;  %v1586_v16 = vrot.slane %v1572_v51, %v3276_v40 }
 0x11e   :  { %1805 = vrot.lane.b32.xlu0 %v1292_v38, %s3035_s2  ;;  %v1307_v61 = vrot.slane %v1299_v28, %v3276_v40 }
 0x11f   :  { %v1587_v42 = vcombine.low %v594_v20, %v602_v46  ;;  %v1588_v52 = vcombine.high %v594_v20, %v602_v46  ;;  %v1315_v4 = vcombine.low %v593_v14, %v601_v29  ;;  %v1316_v48 = vcombine.high %v593_v14, %v601_v29 }
 0x120   :  { %v317_v31 = vpop.permute.xlu1 %316  ;;  %v313_v59 = vpop.permute.xlu0 %312  ;;  %v1314_v20 = vrot.slane %v1300_v60, %v3276_v40 }
 0x121   :  { %v1595_v11 = vrot.slane %v1587_v42, %v3276_v40  ;;  %v1602_v38 = vrot.slane %v1588_v52, %v3276_v40  ;;  %v1323_v23 = vrot.slane %v1315_v4, %v3276_v40  ;;  %v1330_v34 = vrot.slane %v1316_v48, %v3276_v40  ;;  %1885 = vrot.lane.b32.xlu1 %v1569_v22, %s3036_s25 }
 0x122   :  { %1853 = vrot.lane.b32.xlu0 %v1564_v2, %s3035_s2  ;;  %v606_v60 = vmul.f32 %v3238_v0, %v317_v31  ;;  %v605_v2 = vmul.f32 %v3238_v0, %v313_v59 }
 0x123   :  { %v1635_v14 = vcombine.low %v1579_v57, %v1595_v11  ;;  %v1636_v3 = vcombine.high %v1579_v57, %v1595_v11  ;;  %v1651_v46 = vcombine.low %v1586_v16, %v1602_v38  ;;  %v1652_v51 = vcombine.high %v1586_v16, %v1602_v38 }
 0x124   :  { %v336_v29 = vpop.permute.xlu1 %335  ;;  %v332_v42 = vpop.permute.xlu0 %331  ;;  %v1363_v47 = vcombine.low %v1307_v61, %v1323_v23  ;;  %v1364_v52 = vcombine.high %v1307_v61, %v1323_v23  ;;  %v1379_v45 = vcombine.low %v1314_v20, %v1330_v34  ;;  %v1380_v4 = vcombine.high %v1314_v20, %v1330_v34 }
 0x125   :  { %1845 = vrot.lane.b32.xlu1 %v1298_v41, %s3037_s26  ;;  %v610_v31 = vmul.f32 %v3245_v6, %v336_v29  ;;  %v609_v0 = vmul.f32 %v3245_v6, %v332_v42  ;;  %v3823_v35 = vrot.slane %v1635_v14, %v3315_v24  ;;  %v3826_v10 = vrot.slane %v1636_v3, %v3315_v24 }
 0x126   :  { %1813 = vrot.lane.b32.xlu0 %v1293_v55, %s3036_s25  ;;  %v3837_v61 = vrot.slane %v1363_v47, %v3315_v24  ;;  %v1378_v20 = vrot.slane %v1364_v52, %v3315_v24  ;;  %v1394_v47 = vrot.slane %v1380_v4, %v3315_v24 }
 0x128   :  { %v355_v22 = vpop.permute.xlu1 %354  ;;  %v351_v28 = vpop.permute.xlu0 %350 }
 0x129   :  { %v614_v48 = vmul.f32 %v3248_v9, %v355_v22  ;;  %v613_v57 = vmul.f32 %v3248_v9, %v351_v28  ;;  %1893 = vrot.lane.b32.xlu1 %v1570_v53, %s3037_s26  ;;  %v3829_v53 = vrot.slane %v1651_v46, %v3315_v24 }
 0x12a   :  { %1861 = vrot.lane.b32.xlu0 %v1565_v39, %s3036_s25  ;;  %v1666_v39 = vrot.slane %v1652_v51, %v3315_v24 }
 0x12b   :  { %v1603_v16 = vcombine.low %v606_v60, %v614_v48  ;;  %v1604_v11 = vcombine.high %v606_v60, %v614_v48  ;;  %v1331_v41 = vcombine.low %v605_v2, %v613_v57  ;;  %v1332_v38 = vcombine.high %v605_v2, %v613_v57 }
 0x12c   :  { %v374_v55 = vpop.permute.xlu1 %373  ;;  %v370_v23 = vpop.permute.xlu0 %369 }
 0x12d   :  { %v618_v59 = vmul.f32 %v3255_v15, %v374_v55  ;;  %v617_v9 = vmul.f32 %v3255_v15, %v370_v23  ;;  %1869 = vrot.lane.b32.xlu1 %v1566_v30, %s3037_s26  ;;  %v1611_v14 = vrot.slane %v1603_v16, %v3276_v40  ;;  %v1618_v3 = vrot.slane %v1604_v11, %v3276_v40 }
 0x12e   :  { %1821 = vrot.lane.b32.xlu0 %v1294_v18, %s3037_s26  ;;  %v3847_v18 = vrot.slane %v1379_v45, %v3315_v24  ;;  %v1339_v29 = vrot.slane %v1331_v41, %v3276_v40  ;;  %v1346_v42 = vrot.slane %v1332_v38, %v3276_v40 }
 0x12f   :  { %v1619_v6 = vcombine.low %v610_v31, %v618_v59  ;;  %v1620_v15 = vcombine.high %v610_v31, %v618_v59  ;;  %v1347_v34 = vcombine.low %v609_v0, %v617_v9  ;;  %v1348_v30 = vcombine.high %v609_v0, %v617_v9 }
 0x131   :  { %v1627_v46 = vrot.slane %v1619_v6, %v3276_v40  ;;  %v1634_v51 = vrot.slane %v1620_v15, %v3276_v40  ;;  %v1355_v26 = vrot.slane %v1347_v34, %v3276_v40  ;;  %v1362_v5 = vrot.slane %v1348_v30, %v3276_v40 }
 0x133   :  { %v1667_v52 = vcombine.low %v1611_v14, %v1627_v46  ;;  %v1668_v22 = vcombine.high %v1611_v14, %v1627_v46  ;;  %v1683_v28 = vcombine.low %v1618_v3, %v1634_v51  ;;  %v1684_v60 = vcombine.high %v1618_v3, %v1634_v51 }
 0x134   :  { %v1395_v2 = vcombine.low %v1339_v29, %v1355_v26  ;;  %v1396_v48 = vcombine.high %v1339_v29, %v1355_v26  ;;  %v1411_v57 = vcombine.low %v1346_v42, %v1362_v5  ;;  %v1412_v16 = vcombine.high %v1346_v42, %v1362_v5 }
 0x135   :  { %v3853_v11 = vrot.slane %v1667_v52, %v3315_v24  ;;  %v1682_v45 = vrot.slane %v1668_v22, %v3315_v24  ;;  %v3857_v55 = vrot.slane %v1683_v28, %v3315_v24  ;;  %v1698_v4 = vrot.slane %v1684_v60, %v3315_v24  ;;  %v4044_v22 = vld [vmem:[#allocation17_spill] sm:$0xff] }
 0x136   :  { %v3861_v40 = vrot.slane %v1395_v2, %v3315_v24  ;;  %v1410_v41 = vrot.slane %v1396_v48, %v3315_v24  ;;  %v3865_v38 = vrot.slane %v1411_v57, %v3315_v24  ;;  %v1426_v23 = vrot.slane %v1412_v16, %v3315_v24 }
 0x137   :  { %v1704_v31 = vcombine.high %v3829_v53, %v3857_v55  ;;  %v1705_v0 = vcombine.low %v1666_v39, %v1698_v4  ;;  %v1700_v59 = vcombine.high %v3823_v35, %v3853_v11  ;;  %v1706_v9 = vcombine.high %v1666_v39, %v1698_v4  ;;  %v4047_v4 = vld [vmem:[#allocation16_spill] sm:$0xff] }
 0x138   :  { %v1432_v6 = vcombine.high %v3847_v18, %v3865_v38  ;;  %v1433_v15 = vcombine.low %v1394_v47, %v1426_v23  ;;  %v1428_v34 = vcombine.high %v3837_v61, %v3861_v40  ;;  %v1434_v30 = vcombine.high %v1394_v47, %v1426_v23 }
 0x139   :  { %1879 = vrot.lane.b32.xlu1 %v1704_v31, %s3035_s2  ;;  %v1429_v14 = vcombine.low %v1378_v20, %v1410_v41  ;;  %v1701_v24 = vcombine.low %v3826_v10, %v1682_v45  ;;  %v1702_v3 = vcombine.high %v3826_v10, %v1682_v45  ;;  %v1430_v46 = vcombine.high %v1378_v20, %v1410_v41  ;;  %v4046_v45 = vld [vmem:[#allocation13_spill] sm:$0xff] }
 0x13a   :  { %1831 = vrot.lane.b32.xlu0 %v1432_v6, %s3035_s2  ;;  %v1703_v39 = vcombine.low %v3829_v53, %v3857_v55  ;;  %v1431_v51 = vcombine.low %v3847_v18, %v3865_v38  ;;  %v1427_v26 = vcombine.low %v3837_v61, %v3861_v40  ;;  %v1699_v5 = vcombine.low %v3823_v35, %v3853_v11  ;;  %v1988_v11 = vld [vmem:[#allocation2 + $0x90] sm:$0xff]  ;;  %v1978_v61 = vld [vmem:[#allocation2 + $0x40] sm:$0xff] }
 0x13b   :  { %v4045_v28 = vcombine.low %v3339_v21, %v4044_v22  ;;  %v4048_v41 = vcombine.low %v4046_v45, %v4047_v4  ;;  %v2087_v21 = vld [vmem:[#allocation8 + $0x308] sm:$0xff] }
 0x13d   :  { %1839 = vrot.lane.b32.xlu1 %v1433_v15, %s3036_s25 }
 0x13e   :  { %1807 = vrot.lane.b32.xlu0 %v1428_v34, %s3035_s2  ;;  %v2055_v34 = vld [vmem:[#allocation8 + $0x208] sm:$0xff] }
 0x141   :  { %1887 = vrot.lane.b32.xlu1 %v1705_v0, %s3036_s25 }
 0x142   :  { %1855 = vrot.lane.b32.xlu0 %v1700_v59, %s3035_s2  ;;  %v2054_v59 = vld [vmem:[#allocation8 + $0x200] sm:$0xff] }
 0x143   :  { %v2809_v45 = vpack.c.bf16 %v2055_v34, %v2054_v59 }
 0x145   :  { %1847 = vrot.lane.b32.xlu1 %v1434_v30, %s3037_s26  ;;  %v2104_v30 = vld [vmem:[#allocation8 + $0x390] sm:$0xff] }
 0x146   :  { %1815 = vrot.lane.b32.xlu0 %v1429_v14, %s3036_s25  ;;  %v2105_v14 = vld [vmem:[#allocation8 + $0x398] sm:$0xff] }
 0x147   :  { %v2843_v4 = vpack.c.bf16 %v2105_v14, %v2104_v30  ;;  %v2090_v14 = vld [vmem:[#allocation8 + $0x320] sm:$0xff] }
 0x149   :  { %1895 = vrot.lane.b32.xlu1 %v1706_v9, %s3037_s26  ;;  %v2086_v9 = vld [vmem:[#allocation8 + $0x300] sm:$0xff] }
 0x14a   :  { %1863 = vrot.lane.b32.xlu0 %v1701_v24, %s3036_s25  ;;  %v2072_v24 = vld [vmem:[#allocation8 + $0x290] sm:$0xff]  ;;  %v2841_v22 = vpack.c.bf16 %v2087_v21, %v2086_v9  ;;  %v2057_v9 = vld [vmem:[#allocation8 + $0x218] sm:$0xff]  ;;  %v2106_v21 = vld [vmem:[#allocation8 + $0x3a0] sm:$0xff] }
 0x14b   :  { %v1782_v10 = vpop.permute.xlu1 %1781 }
 0x14c   :  { %v1734_v20 = vpop.permute.xlu0 %1733  ;;  %v1920_v23 = vsel %vm1899_vm0, %v4048_v41, %v1782_v10  ;;  %v2056_v41 = vld [vmem:[#allocation8 + $0x210] sm:$0xff] }
 0x14d   :  { %1871 = vrot.lane.b32.xlu1 %v1702_v3, %s3037_s26  ;;  %v1908_v60 = vsel %vm1899_vm0, %v4045_v28, %v1734_v20  ;;  %v2073_v3 = vld [vmem:[#allocation8 + $0x298] sm:$0xff]  ;;  %v4050_v20 = vld [vmem:[#allocation19_spill] sm:$0xff]  ;;  %v2813_v34 = vpack.c.bf16 %v2057_v9, %v2056_v41 }
 0x14e   :  { %1823 = vrot.lane.b32.xlu0 %v1430_v46, %s3037_s26  ;;  %v4049_v46 = vld [vmem:[#allocation15_spill] sm:$0xff]  ;;  %v4053_v28 = vld [vmem:[#allocation18_spill] sm:$0xff] }
 0x14f   :  { %v1742_v47 = vpop.permute.xlu1 %1741  ;;  %v2093_v41 = vld [vmem:[#allocation8 + $0x338] sm:$0xff] }
 0x150   :  { %v1710_v29 = vpop.permute.xlu0 %1709  ;;  %v1910_v2 = vsel %vm1902_vm1, %v1908_v60, %v1742_v47  ;;  %v4051_v47 = vcombine.low %v4049_v46, %v4050_v20  ;;  %v2107_v20 = vld [vmem:[#allocation8 + $0x3a8] sm:$0xff] }
 0x151   :  { %v2847_v30 = vpack.c.bf16 %v2107_v20, %v2106_v21 }
 0x154   :  { %v1790_v42 = vpop.permute.xlu1 %1789  ;;  %v1758_v52 = vpop.permute.xlu0 %1757 }
 0x155   :  { %v1922_v31 = vsel %vm1902_vm1, %v1920_v23, %v1790_v42  ;;  %v1914_v10 = vsel %vm1899_vm0, %v4051_v47, %v1758_v52  ;;  %v4052_v42 = vld [vmem:[#allocation14_spill] sm:$0xff]  ;;  %v2088_v23 = vld [vmem:[#allocation8 + $0x310] sm:$0xff]  ;;  %v2811_v52 = vpack.c.bf16 %v2073_v3, %v2072_v24  ;;  %v2059_v3 = vld [vmem:[#allocation8 + $0x228] sm:$0xff] }
 0x156   :  { %v4054_v60 = vcombine.low %v4052_v42, %v4053_v28  ;;  %v2108_v42 = vld [vmem:[#allocation8 + $0x3b0] sm:$0xff]  ;;  %v2109_v28 = vld [vmem:[#allocation8 + $0x3b8] sm:$0xff] }
 0x158   :  { %v1750_v48 = vpop.permute.xlu1 %1749  ;;  %v1718_v16 = vpop.permute.xlu0 %1717 }
 0x159   :  { %v1912_v57 = vsel %vm1905_vm2, %v1910_v2, %v1750_v48  ;;  %v1900_v2 = vsel %vm1899_vm0, %v4054_v60, %v1710_v29  ;;  %v2074_v29 = vld [vmem:[#allocation8 + $0x2a0] sm:$0xff]  ;;  %v2076_v60 = vld [vmem:[#allocation8 + $0x2b0] sm:$0xff] }
 0x15a   :  { %2221 = vmatprep.mubr.f32.mxu0 %v1912_v57 }
 0x15c   :  { %v1798_v0 = vpop.permute.xlu1 %1797  ;;  %v1766_v15 = vpop.permute.xlu0 %1765 }
 0x15d   :  { %v1924_v6 = vsel %vm1905_vm2, %v1922_v31, %v1798_v0  ;;  %v1916_v48 = vsel %vm1902_vm1, %v1914_v10, %v1766_v15  ;;  %v2089_v31 = vld [vmem:[#allocation8 + $0x318] sm:$0xff]  ;;  %v1903_v0 = vsel %vm1902_vm1, %v1900_v2, %v1718_v16  ;;  %v2075_v15 = vld [vmem:[#allocation8 + $0x2a8] sm:$0xff]  ;;  %v2058_v16 = vld [vmem:[#allocation8 + $0x220] sm:$0xff] }
 0x15e   :  { %2296 = vmatprep.mubr.f32.mxu1 %v1924_v6  ;;  %v2845_v59 = vpack.c.bf16 %v2089_v31, %v2088_v23  ;;  %v2091_v10 = vld [vmem:[#allocation8 + $0x328] sm:$0xff]  ;;  %v2815_v24 = vpack.c.bf16 %v2075_v15, %v2074_v29  ;;  %v2077_v2 = vld [vmem:[#allocation8 + $0x2b8] sm:$0xff]  ;;  %v2062_v29 = vld [vmem:[#allocation8 + $0x240] sm:$0xff] }
 0x15f   :  { %v2819_v23 = vpack.c.bf16 %v2077_v2, %v2076_v60  ;;  %v2061_v31 = vld [vmem:[#allocation8 + $0x238] sm:$0xff]  ;;  %v2094_v15 = vld [vmem:[#allocation8 + $0x340] sm:$0xff] }
 0x160   :  { %v1774_v57 = vpop.permute.xlu1 %1773  ;;  %v1726_v46 = vpop.permute.xlu0 %1725 }
 0x161   :  { %v1918_v6 = vsel %vm1905_vm2, %v1916_v48, %v1774_v57  ;;  %v1906_v47 = vsel %vm1905_vm2, %v1903_v0, %v1726_v46  ;;  %v2849_v48 = vpack.c.bf16 %v2091_v10, %v2090_v14  ;;  %v2851_v57 = vpack.c.bf16 %v2109_v28, %v2108_v42  ;;  %v2110_v0 = vld [vmem:[#allocation8 + $0x3c0] sm:$0xff]  ;;  %v2112_v14 = vld [vmem:[#allocation8 + $0x3d0] sm:$0xff]  ;;  %v2113_v10 = vld [vmem:[#allocation8 + $0x3d8] sm:$0xff] }
 0x162   :  { %2297 = vmatmul.mubr.f32.vlgmr.msra.gmra.mrb[0].mxu1 %v1918_v6  ;;  %2222 = vmatmul.mubr.f32.vlgmr.msra.gmra.mrb[0].mxu0 %v1906_v47  ;;  %v2111_v6 = vld [vmem:[#allocation8 + $0x3c8] sm:$0xff]  ;;  %v2078_v46 = vld [vmem:[#allocation8 + $0x2c0] sm:$0xff]  ;;  %v2859_v2 = vpack.c.bf16 %v2113_v10, %v2112_v14  ;;  %v2116_v14 = vld [vmem:[#allocation8 + $0x3f0] sm:$0xff] }
 0x163   :  { %2842 = vmatpush3.bf16.msra.mxu1 %v2841_v22  ;;  %2810 = vmatpush3.bf16.msra.mxu0 %v2809_v45  ;;  %v2817_v22 = vpack.c.bf16 %v2059_v3, %v2058_v16  ;;  %v2060_v45 = vld [vmem:[#allocation8 + $0x230] sm:$0xff]  ;;  %v2855_v47 = vpack.c.bf16 %v2111_v6, %v2110_v0  ;;  %v2063_v16 = vld [vmem:[#allocation8 + $0x248] sm:$0xff]  ;;  %v2081_v3 = vld [vmem:[#allocation8 + $0x2d8] sm:$0xff] }
 0x164   :  { %2844 = vmatprep.subr.bf16.mxu1 %v2843_v4  ;;  %2812 = vmatprep.subr.bf16.mxu0 %v2811_v52  ;;  %v2092_v4 = vld [vmem:[#allocation8 + $0x330] sm:$0xff]  ;;  %v2079_v52 = vld [vmem:[#allocation8 + $0x2c8] sm:$0xff]  ;;  %v2821_v20 = vpack.c.bf16 %v2061_v31, %v2060_v45  ;;  %v2825_v60 = vpack.c.bf16 %v2063_v16, %v2062_v29  ;;  %v2082_v0 = vld [vmem:[#allocation8 + $0x2e0] sm:$0xff] }
 0x165   :  { %v2853_v9 = vpack.c.bf16 %v2093_v41, %v2092_v4  ;;  %v2065_v41 = vld [vmem:[#allocation8 + $0x258] sm:$0xff]  ;;  %v2115_v31 = vld [vmem:[#allocation8 + $0x3e8] sm:$0xff]  ;;  %v2098_v29 = vld [vmem:[#allocation8 + $0x360] sm:$0xff] }
 0x166   :  { %v2083_v6 = vld [vmem:[#allocation8 + $0x2e8] sm:$0xff]  ;;  %v2117_v10 = vld [vmem:[#allocation8 + $0x3f8] sm:$0xff] }
 0x167   :  { %2846 = vmatpush3.bf16.msra.mxu1 %v2845_v59  ;;  %2814 = vmatpush3.bf16.msra.mxu0 %v2813_v34  ;;  %v2095_v59 = vld [vmem:[#allocation8 + $0x348] sm:$0xff]  ;;  %v2831_v16 = vpack.c.bf16 %v2083_v6, %v2082_v0 }
 0x168   :  { %2848 = vmatprep.subr.bf16.mxu1 %v2847_v30  ;;  %2816 = vmatprep.subr.bf16.mxu0 %v2815_v24  ;;  %v2823_v30 = vpack.c.bf16 %v2079_v52, %v2078_v46  ;;  %v2080_v24 = vld [vmem:[#allocation8 + $0x2d0] sm:$0xff]  ;;  %v2857_v42 = vpack.c.bf16 %v2095_v59, %v2094_v15  ;;  %v2099_v15 = vld [vmem:[#allocation8 + $0x368] sm:$0xff] }
 0x169   :  { %v2827_v4 = vpack.c.bf16 %v2081_v3, %v2080_v24  ;;  %v2084_v24 = vld [vmem:[#allocation8 + $0x2f0] sm:$0xff]  ;;  %v2085_v3 = vld [vmem:[#allocation8 + $0x2f8] sm:$0xff] }
 0x16a   :  { %v2835_v6 = vpack.c.bf16 %v2085_v3, %v2084_v24 }
 0x16b   :  { %2850 = vmatpush3.bf16.msra.mxu1 %v2849_v48  ;;  %v3922_v21 = vpop.permute.xlu1 %1783  ;;  %2818 = vmatpush3.bf16.msra.mxu0 %v2817_v22  ;;  %v2064_v48 = vld [vmem:[#allocation8 + $0x250] sm:$0xff] }
 0x16c   :  { %2852 = vmatprep.subr.bf16.mxu1 %v2851_v57  ;;  %v1736_v34 = vpop.permute.xlu0 %1735  ;;  %2820 = vmatprep.subr.bf16.mxu0 %v2819_v23  ;;  %v2096_v22 = vld [vmem:[#allocation8 + $0x350] sm:$0xff]  ;;  %v2097_v57 = vld [vmem:[#allocation8 + $0x358] sm:$0xff]  ;;  %v2114_v23 = vld [vmem:[#allocation8 + $0x3e0] sm:$0xff] }
 0x16d   :  { %v2861_v46 = vpack.c.bf16 %v2097_v57, %v2096_v22  ;;  %v2867_v57 = vpack.c.bf16 %v2117_v10, %v2116_v14 }
 0x16f   :  { %2854 = vmatpush3.bf16.msra.mxu1 %v2853_v9  ;;  %v1744_v28 = vpop.permute.xlu1 %1743  ;;  %2822 = vmatpush3.bf16.msra.mxu0 %v2821_v20  ;;  %v2829_v9 = vpack.c.bf16 %v2065_v41, %v2064_v48  ;;  %v2863_v20 = vpack.c.bf16 %v2115_v31, %v2114_v23  ;;  %v2100_v41 = vld [vmem:[#allocation8 + $0x370] sm:$0xff]  ;;  %v2101_v23 = vld [vmem:[#allocation8 + $0x378] sm:$0xff] }
 0x170   :  { %2856 = vmatprep.subr.bf16.mxu1 %v2855_v47  ;;  %v1712_v45 = vpop.permute.xlu0 %1711  ;;  %2824 = vmatprep.subr.bf16.mxu0 %v2823_v30  ;;  %v2066_v47 = vld [vmem:[#allocation8 + $0x260] sm:$0xff]  ;;  %v2067_v30 = vld [vmem:[#allocation8 + $0x268] sm:$0xff] }
 0x171   :  { %v2833_v22 = vpack.c.bf16 %v2067_v30, %v2066_v47  ;;  %v1901_v44 = vsel %vm1899_vm0, %v883_v62, %v1712_v45 }
 0x173   :  { %2858 = vmatpush3.bf16.msra.mxu1 %v2857_v42  ;;  %v1792_v52 = vpop.permute.xlu1 %1791  ;;  %2826 = vmatpush3.bf16.msra.mxu0 %v2825_v60  ;;  %v1909_v42 = vsel %vm1899_vm0, %v887_v25, %v1736_v34  ;;  %v2865_v60 = vpack.c.bf16 %v2099_v15, %v2098_v29  ;;  %v2135_v25 = vld [vmem:[#allocation8 + $0x488] sm:$0xff]  ;;  %v1921_v34 = vsel %vm1899_vm0, %v1159_v37, %v3922_v21 }
 0x174   :  { %2860 = vmatprep.subr.bf16.mxu1 %v2859_v2  ;;  %v1760_v59 = vpop.permute.xlu0 %1759  ;;  %2828 = vmatprep.subr.bf16.mxu0 %v2827_v4  ;;  %v1911_v2 = vsel %vm1902_vm1, %v1909_v42, %v1744_v28  ;;  %v2068_v4 = vld [vmem:[#allocation8 + $0x270] sm:$0xff]  ;;  %v2869_v28 = vpack.c.bf16 %v2101_v23, %v2100_v41  ;;  %v2871_v47 = vpack.c.bf16 %v2135_v25, %v2134_v63 }
 0x175   :  { %v1915_v1 = vsel %vm1899_vm0, %v1155_v32, %v1760_v59 }
 0x177   :  { %2862 = vmatpush3.bf16.msra.mxu1 %v2861_v46  ;;  %v1752_v48 = vpop.permute.xlu1 %1751  ;;  %2830 = vmatpush3.bf16.msra.mxu0 %v2829_v9  ;;  %v1923_v46 = vsel %vm1902_vm1, %v1921_v34, %v1792_v52 }
 0x178   :  { %2864 = vmatprep.subr.bf16.mxu1 %v2863_v20  ;;  %v1913_v31 = vsel %vm1905_vm2, %v1911_v2, %v1752_v48  ;;  %v1720_v0 = vpop.permute.xlu0 %1719  ;;  %2832 = vmatprep.subr.bf16.mxu0 %v2831_v16  ;;  %v2837_v20 = vpack.c.bf16 %v2069_v58, %v2068_v4  ;;  %v2118_v48 = vld [vmem:[#allocation8 + $0x400] sm:$0xff]  ;;  %v4055_v4 = vcombine.low %v3718_v12, %v3750_v36  ;;  %v2121_v58 = vld [vmem:[#allocation8 + $0x418] sm:$0xff]  ;;  %v2139_v36 = vld [vmem:[#allocation8 + $0x4a8] sm:$0xff] }
 0x179   :  { %2226 = vmatprep.mubr.f32.mxu0 %v1913_v31  ;;  %v1904_v52 = vsel %vm1902_vm1, %v1901_v44, %v1720_v0  ;;  %v2138_v12 = vld [vmem:[#allocation8 + $0x4a0] sm:$0xff]  ;;  %v2125_v44 = vld [vmem:[#allocation8 + $0x438] sm:$0xff] }
 0x17a   :  { %v2879_v27 = vpack.c.bf16 %v2139_v36, %v2138_v12  ;;  %v1989_v12 = vld [vmem:[#allocation2 + $0x98] sm:$0xff] }
 0x17b   :  { %2866 = vmatpush3.bf16.msra.mxu1 %v2865_v60  ;;  %v1800_v9 = vpop.permute.xlu1 %1799  ;;  %2834 = vmatpush3.bf16.msra.mxu0 %v2833_v22  ;;  %v2119_v22 = vld [vmem:[#allocation8 + $0x408] sm:$0xff] }
 0x17c   :  { %2868 = vmatprep.subr.bf16.mxu1 %v2867_v57  ;;  %v1925_v29 = vsel %vm1905_vm2, %v1923_v46, %v1800_v9  ;;  %v1768_v15 = vpop.permute.xlu0 %1767  ;;  %2836 = vmatprep.subr.bf16.mxu0 %v2835_v6  ;;  %v2137_v57 = vld [vmem:[#allocation8 + $0x498] sm:$0xff]  ;;  %v2873_v23 = vpack.c.bf16 %v2119_v22, %v2118_v48  ;;  %v2120_v6 = vld [vmem:[#allocation8 + $0x410] sm:$0xff]  ;;  %v2122_v46 = vld [vmem:[#allocation8 + $0x420] sm:$0xff] }
 0x17d   :  { %2301 = vmatprep.mubr.f32.mxu1 %v1925_v29  ;;  %v1917_v37 = vsel %vm1902_vm1, %v1915_v1, %v1768_v15  ;;  %v2877_v8 = vpack.c.bf16 %v2121_v58, %v2120_v6  ;;  %v2123_v9 = vld [vmem:[#allocation8 + $0x428] sm:$0xff]  ;;  %v2124_v1 = vld [vmem:[#allocation8 + $0x430] sm:$0xff]  ;;  %v2130_v22 = vld [vmem:[#allocation8 + $0x460] sm:$0xff] }
 0x17e   :  { %v2881_v29 = vpack.c.bf16 %v2123_v9, %v2122_v46  ;;  %v2552_v46 = vld [vmem:[%s4018_s3] ss:$0 sm:$0xff]  ;;  %s3038_s3 = smov [#allocation9]  }
 0x17f   :  { %2870 = vmatpush3.bf16.msra.mxu1 %v2869_v28  ;;  %v1776_v21 = vpop.permute.xlu1 %1775  ;;  %2838 = vmatpush3.bf16.msra.mxu0 %v2837_v20  ;;  %v2140_v20 = vld [vmem:[#allocation8 + $0x4b0] sm:$0xff]  ;;  %s2539_s5 = sshll.u32 %s3038_s3, 4  ;;  %s2540_s5 = int_to_ptr.vmem [resolvable:$true] %s2539_s5 }
 0x180   :  { %2903 = vmatprep.subr.bf16.mxu1 %v2871_v47  ;;  %v1919_v16 = vsel %vm1905_vm2, %v1917_v37, %v1776_v21  ;;  %v1728_v30 = vpop.permute.xlu0 %1727  ;;  %2872 = vmatprep.subr.bf16.mxu0 %v2871_v47  ;;  %v2141_v47 = vld [vmem:[#allocation8 + $0x4b8] sm:$0xff]  ;;  %v2142_v37 = vld [vmem:[#allocation8 + $0x4c0] sm:$0xff]  ;;  %v2143_v21 = vld [vmem:[#allocation8 + $0x4c8] sm:$0xff]  ;;  %s2998_s6 = scalar_lea.vmem %s2540_s5, 256  ;;  %p3003_p11 = scmp.lt.s32.totalorder %s2540_s5, %s2540_s5 }
 0x181   :  { %v1907_v54 = vsel %vm1905_vm2, %v1904_v52, %v1728_v30  ;;  %2302 = vmatmul.mubr.f32.gmra.mrb[2].mxu1 %v1919_v16  ;;  %v2883_v15 = vpack.c.bf16 %v2141_v47, %v2140_v20  ;;  %v2885_v52 = vpack.c.bf16 %v2125_v44, %v2124_v1  ;;  %v2887_v30 = vpack.c.bf16 %v2143_v21, %v2142_v37  ;;  %p2999_p10 = scmp.ne.s32.totalorder %s2540_s5, %s2998_s6  ;;  %p3004_p12 = scmp.lt.s32.totalorder %s2998_s6, %s2998_s6 }
 0x182   :  { %2227 = vmatmul.mubr.f32.gmra.mrb[2].mxu0 %v1907_v54  ;;  %v2126_v54 = vld [vmem:[#allocation8 + $0x440] sm:$0xff] }
 0x183   :  { %p3005_p13 = por %p3004_p12, %p3003_p11 }
 0x185   :  { %p3006_p0 = pnand %p3005_p13, %p2999_p10 }
 0x18b   :  { %v1878_v43 = vpop.permute.xlu1 %1877 }
 0x18c   :  { %v1830_v32 = vpop.permute.xlu0 %1829  ;;  %v1944_v42 = vsel %vm1899_vm0, %v1567_v33, %v1878_v43  ;;  %v2127_v43 = vld [vmem:[#allocation8 + $0x448] sm:$0xff] }
 0x18d   :  { %v1932_v59 = vsel %vm1899_vm0, %v1295_v7, %v1830_v32  ;;  %v2136_v7 = vld [vmem:[#allocation8 + $0x490] sm:$0xff] }
 0x18e   :  { %v2875_v0 = vpack.c.bf16 %v2137_v57, %v2136_v7  ;;  %v2148_v7 = vld [vmem:[#allocation8 + $0x4f0] sm:$0xff]  ;;  %v2149_v57 = vld [vmem:[#allocation8 + $0x4f8] sm:$0xff] }
 0x18f   :  { %v1838_v17 = vpop.permute.xlu1 %1837 }
 0x190   :  { %v1806_v49 = vpop.permute.xlu0 %1805  ;;  %v1934_v14 = vsel %vm1902_vm1, %v1932_v59, %v1838_v17  ;;  %v2144_v17 = vld [vmem:[#allocation8 + $0x4d0] sm:$0xff] }
 0x191   :  { %v1926_v50 = vsel %vm1899_vm0, %v4056_v56, %v1806_v49  ;;  %v2145_v49 = vld [vmem:[#allocation8 + $0x4d8] sm:$0xff] }
 0x192   :  { %v2891_v59 = vpack.c.bf16 %v2145_v49, %v2144_v17 }
 0x193   :  { %v1886_v62 = vpop.permute.xlu1 %1885 }
 0x194   :  { %v1854_v45 = vpop.permute.xlu0 %1853  ;;  %v1946_v60 = vsel %vm1902_vm1, %v1944_v42, %v1886_v62  ;;  %v2889_v62 = vpack.c.bf16 %v2127_v43, %v2126_v54  ;;  %v2147_v42 = vld [vmem:[#allocation8 + $0x4e8] sm:$0xff] }
 0x195   :  { %v1938_v41 = vsel %vm1899_vm0, %v4055_v4, %v1854_v45 }
 0x197   :  { %v1846_v10 = vpop.permute.xlu1 %1845 }
 0x198   :  { %v1936_v24 = vsel %vm1905_vm2, %v1934_v14, %v1846_v10  ;;  %v1814_v3 = vpop.permute.xlu0 %1813  ;;  %v2128_v14 = vld [vmem:[#allocation8 + $0x450] sm:$0xff]  ;;  %v2129_v10 = vld [vmem:[#allocation8 + $0x458] sm:$0xff] }
 0x199   :  { %2371 = vmatprep.mubr.f32.mxu0 %v1936_v24  ;;  %v1928_v63 = vsel %vm1902_vm1, %v1926_v50, %v1814_v3  ;;  %v2146_v3 = vld [vmem:[#allocation8 + $0x4e0] sm:$0xff]  ;;  %v2899_v50 = vpack.c.bf16 %v2149_v57, %v2148_v7 }
 0x19a   :  { %v2895_v48 = vpack.c.bf16 %v2147_v42, %v2146_v3 }
 0x19b   :  { %v1894_v2 = vpop.permute.xlu1 %1893 }
 0x19c   :  { %v1948_v13 = vsel %vm1905_vm2, %v1946_v60, %v1894_v2  ;;  %v1862_v19 = vpop.permute.xlu0 %1861  ;;  %v2893_v60 = vpack.c.bf16 %v2129_v10, %v2128_v14 }
 0x19d   :  { %2446 = vmatprep.mubr.f32.mxu1 %v1948_v13  ;;  %v1940_v33 = vsel %vm1902_vm1, %v1938_v41, %v1862_v19  ;;  %v2131_v13 = vld [vmem:[#allocation8 + $0x468] sm:$0xff] }
 0x19e   :  { %v2897_v41 = vpack.c.bf16 %v2131_v13, %v2130_v22 }
 0x19f   :  { %v1870_v31 = vpop.permute.xlu1 %1869 }
 0x1a0   :  { %v1942_v25 = vsel %vm1905_vm2, %v1940_v33, %v1870_v31  ;;  %v1822_v34 = vpop.permute.xlu0 %1821  ;;  %v2132_v33 = vld [vmem:[#allocation8 + $0x470] sm:$0xff]  ;;  %v2133_v31 = vld [vmem:[#allocation8 + $0x478] sm:$0xff] }
 0x1a1   :  { %v1930_v28 = vsel %vm1905_vm2, %v1928_v63, %v1822_v34  ;;  %2447 = vmatmul.mubr.f32.vlgmr.msra.gmra.mrb[4].mxu1 %v1942_v25  ;;  %v2901_v38 = vpack.c.bf16 %v2133_v31, %v2132_v33 }
 0x1a2   :  { %2372 = vmatmul.mubr.f32.vlgmr.msra.gmra.mrb[4].mxu0 %v1930_v28  ;;  %2911 = vmatpush3.bf16.msra.mxu1 %v2873_v23 }
 0x1a3   :  { %2874 = vmatpush3.bf16.msra.mxu0 %v2873_v23  ;;  %2904 = vmatprep.subr.bf16.mxu1 %v2875_v0 }
 0x1a4   :  { %2876 = vmatprep.subr.bf16.mxu0 %v2875_v0 }
 0x1a6   :  { %2912 = vmatpush3.bf16.msra.mxu1 %v2877_v8 }
 0x1a7   :  { %2878 = vmatpush3.bf16.msra.mxu0 %v2877_v8  ;;  %2905 = vmatprep.subr.bf16.mxu1 %v2879_v27 }
 0x1a8   :  { %2880 = vmatprep.subr.bf16.mxu0 %v2879_v27  ;;  %v1979_v27 = vld [vmem:[#allocation2 + $0x48] sm:$0xff] }
 0x1aa   :  { %2913 = vmatpush3.bf16.msra.mxu1 %v2881_v29 }
 0x1ab   :  { %v1880_v16 = vpop.permute.xlu1 %1879  ;;  %2882 = vmatpush3.bf16.msra.mxu0 %v2881_v29  ;;  %2906 = vmatprep.subr.bf16.mxu1 %v2883_v15 }
 0x1ac   :  { %v1832_v32 = vpop.permute.xlu0 %1831  ;;  %2884 = vmatprep.subr.bf16.mxu0 %v2883_v15  ;;  %v1945_v18 = vsel %vm1899_vm0, %v1703_v39, %v1880_v16 }
 0x1ad   :  { %v1933_v4 = vsel %vm1899_vm0, %v1431_v51, %v1832_v32 }
 0x1ae   :  { %2914 = vmatpush3.bf16.msra.mxu1 %v2885_v52 }
 0x1af   :  { %v1840_v45 = vpop.permute.xlu1 %1839  ;;  %2886 = vmatpush3.bf16.msra.mxu0 %v2885_v52  ;;  %2907 = vmatprep.subr.bf16.mxu1 %v2887_v30 }
 0x1b0   :  { %v1808_v24 = vpop.permute.xlu0 %1807  ;;  %2888 = vmatprep.subr.bf16.mxu0 %v2887_v30  ;;  %v1935_v23 = vsel %vm1902_vm1, %v1933_v4, %v1840_v45 }
 0x1b1   :  { %v1927_v53 = vsel %vm1899_vm0, %v1427_v26, %v1808_v24 }
 0x1b2   :  { %2915 = vmatpush3.bf16.msra.mxu1 %v2889_v62 }
 0x1b3   :  { %v1888_v2 = vpop.permute.xlu1 %1887  ;;  %2890 = vmatpush3.bf16.msra.mxu0 %v2889_v62  ;;  %2908 = vmatprep.subr.bf16.mxu1 %v2891_v59 }
 0x1b4   :  { %v1856_v19 = vpop.permute.xlu0 %1855  ;;  %2892 = vmatprep.subr.bf16.mxu0 %v2891_v59  ;;  %v1947_v51 = vsel %vm1902_vm1, %v1945_v18, %v1888_v2 }
 0x1b5   :  { %v1939_v34 = vsel %vm1899_vm0, %v1699_v5, %v1856_v19 }
 0x1b6   :  { %2916 = vmatpush3.bf16.msra.mxu1 %v2893_v60 }
 0x1b7   :  { %v1848_v56 = vpop.permute.xlu1 %1847  ;;  %2894 = vmatpush3.bf16.msra.mxu0 %v2893_v60  ;;  %2909 = vmatprep.subr.bf16.mxu1 %v2895_v48 }
 0x1b8   :  { %v1937_v0 = vsel %vm1905_vm2, %v1935_v23, %v1848_v56  ;;  %v1816_v6 = vpop.permute.xlu0 %1815  ;;  %2896 = vmatprep.subr.bf16.mxu0 %v2895_v48 }
 0x1b9   :  { %2376 = vmatprep.mubr.f32.mxu0 %v1937_v0  ;;  %v1929_v36 = vsel %vm1902_vm1, %v1927_v53, %v1816_v6 }
 0x1ba   :  { %2917 = vmatpush3.bf16.msra.mxu1 %v2897_v41 }
 0x1bb   :  { %v1896_v58 = vpop.permute.xlu1 %1895  ;;  %2898 = vmatpush3.bf16.msra.mxu0 %v2897_v41  ;;  %2910 = vmatprep.subr.bf16.mxu1 %v2899_v50 }
 0x1bc   :  { %v1949_v63 = vsel %vm1905_vm2, %v1947_v51, %v1896_v58  ;;  %v1864_v25 = vpop.permute.xlu0 %1863  ;;  %2900 = vmatprep.subr.bf16.mxu0 %v2899_v50 }
 0x1bd   :  { %2451 = vmatprep.mubr.f32.mxu1 %v1949_v63  ;;  %v1941_v55 = vsel %vm1902_vm1, %v1939_v34, %v1864_v25 }
 0x1be   :  { %2918 = vmatpush3.bf16.msra.mxu1 %v2901_v38 }
 0x1bf   :  { %v1872_v39 = vpop.permute.xlu1 %1871  ;;  %2902 = vmatpush3.bf16.msra.mxu0 %v2901_v38 }
 0x1c0   :  { %v1943_v28 = vsel %vm1905_vm2, %v1941_v55, %v1872_v39  ;;  %v1824_v8 = vpop.permute.xlu0 %1823 }
 0x1c1   :  { %v1931_v35 = vsel %vm1905_vm2, %v1929_v36, %v1824_v8  ;;  %2452 = vmatmul.mubr.f32.gmra.mrb[6].mxu1 %v1943_v28 }
 0x1c2   :  { %2377 = vmatmul.mubr.f32.gmra.mrb[6].mxu0 %v1931_v35  ;;  %2526 = vmatprep.mubr.f32.mxu1 %v1989_v12 }
 0x1c3   :  { %2521 = vmatprep.mubr.f32.mxu0 %v1979_v27 }
 0x1c5   :  { %2527 = vmatmul.mubr.f32.vlgmr.msra.gmra.mrb[8].mxu1 %v1988_v11 }
 0x1c6   :  { %2522 = vmatmul.mubr.f32.vlgmr.msra.gmra.mrb[8].mxu0 %v1978_v61 }
 0x235   :  { %v2623_v40 = vpop.f32.mrb[0].mxu1  ;;  %v2585_v26 = vpop.f32.mrb[0].mxu0 }
 0x236   :  { %v2624_v5 = vpop.f32.mrb[1].mxu1  ;;  %v2586_v9 = vpop.f32.mrb[1].mxu0 }
 0x237   :  { %v2625_v20 = vadd.f32 %v2624_v5, %v2623_v40  ;;  %v2587_v47 = vadd.f32 %v2586_v9, %v2585_v26 }
 0x239   :  { %v2224_v29 = vadd.f32 %v2587_v47, %v2552_v46 }
 0x23b   :  { %v2299_v15 = vadd.f32 %v2625_v20, %v2224_v29 }
 0x254   :  { %v2626_v1 = vpop.f32.mrb[2].mxu1 }
 0x255   :  { %v2588_v44 = vpop.f32.mrb[2].mxu0  ;;  %v2627_v37 = vpop.f32.mrb[3].mxu1 }
 0x256   :  { %v2589_v21 = vpop.f32.mrb[3].mxu0  ;;  %v2628_v52 = vadd.f32 %v2627_v37, %v2626_v1 }
 0x257   :  { %v2590_v16 = vadd.f32 %v2589_v21, %v2588_v44 }
 0x259   :  { %v2229_v30 = vadd.f32 %v2590_v16, %v2552_v46 }
 0x25b   :  { %v2304_v54 = vadd.f32 %v2628_v52, %v2229_v30 }
 0x274   :  { %v2699_v43 = vpop.f32.mrb[4].mxu1 }
 0x275   :  { %v2661_v32 = vpop.f32.mrb[4].mxu0  ;;  %v2700_v17 = vpop.f32.mrb[5].mxu1 }
 0x276   :  { %v2662_v49 = vpop.f32.mrb[5].mxu0  ;;  %v2701_v62 = vadd.f32 %v2700_v17, %v2699_v43 }
 0x277   :  { %v2663_v45 = vadd.f32 %v2662_v49, %v2661_v32 }
 0x279   :  { %v2374_v59 = vadd.f32 %v2663_v45, %v2299_v15 }
 0x27b   :  { %v2449_v14 = vadd.f32 %v2701_v62, %v2374_v59 }
 0x294   :  { %v2702_v10 = vpop.f32.mrb[6].mxu1 }
 0x295   :  { %v2664_v24 = vpop.f32.mrb[6].mxu0  ;;  %v2703_v3 = vpop.f32.mrb[7].mxu1 }
 0x296   :  { %v2665_v42 = vpop.f32.mrb[7].mxu0  ;;  %v2704_v60 = vadd.f32 %v2703_v3, %v2702_v10 }
 0x297   :  { %v2666_v2 = vadd.f32 %v2665_v42, %v2664_v24 }
 0x298   :  { %v2740_v48 = vpop.f32.mrb[8].mxu1 }
 0x299   :  { %v2379_v22 = vadd.f32 %v2666_v2, %v2304_v54  ;;  %v2737_v13 = vpop.f32.mrb[8].mxu0  ;;  %v2741_v19 = vpop.f32.mrb[9].mxu1 }
 0x29a   :  { %v2738_v7 = vpop.f32.mrb[9].mxu0  ;;  %v2742_v57 = vadd.f32 %v2741_v19, %v2740_v48 }
 0x29b   :  { %v2454_v4 = vadd.f32 %v2704_v60, %v2379_v22  ;;  %v2739_v41 = vadd.f32 %v2738_v7, %v2737_v13 }
 0x29d   :  { %v2524_v23 = vadd.f32 %v2739_v41, %v2449_v14  ;;  %v2529_v56 = vadd.f32 %v2742_v57, %v2454_v4 }
 0x29f   :  { %2532 = vst [vmem:[#allocation9] sm:$0xff] %v2524_v23  ;;  %2533 = vst [vmem:[#allocation9 + $0x8] sm:$0xff] %v2529_v56 }
 0x2a0   :  { %3009 = shalt.err (!%p3006_p0)
}
 0x2a1   :  { %s3010_s9 = scalar_lea.hbm %s4019_s4, 256 }
 0x2a2   :  { %p3011_p1 = scmp.ne.s32.totalorder %s4019_s4, %s3010_s9  ;;  %p3014_p2 = scmp.lt.u32.totalorder %s3010_s9, %s4019_s4 }
 0x2a4   :  { %p3016_p3 = pnand %p3014_p2, %p3011_p1 }
 0x2a6   :  { %3019 = shalt.err (!%p3016_p3)
}
 0x2a7   :  { %2545 = dma.vmem_to_hbm [thread:$0]  %s2540_s5, 256, %s4019_s4, [#allocation5], %s3028_s27, %s3028_s27, %s3029_s28  }
 0x2a8   :  { %3024 = dma.done.wait [#allocation5], 256  }
 0x2a9   :  { %3025 = vsyncadd [#allocation5], 4294967040 }
 0x2aa   :  { %2549 = vsyncpa [#allocation4], 1 }
 0x2ab   :  { %2550 = vsyncpa [#allocation7], 1 }
 0x2ac   :  { %2551 = vsyncpa [#allocation5], 1 }

</bundles_post_ra>
